<compile_context>
chip_gen: v7x
topology: tpu7x:2x2x1
jax: 0.10.0
libtpu: 0.0.40
codegen_flags: <defaults>
</compile_context>

<pallas_src>
import numpy as np

import jax
import jax.numpy as jnp
from jax.experimental import pallas as pl
from jax.experimental.pallas import tpu as pltpu

F32 = jnp.float32
BF16 = jnp.bfloat16
BN_EPS = 1e-5


# --------------------------------------------------------------------------
# BlockSpec helpers
# --------------------------------------------------------------------------
def _vmem():
    return pl.BlockSpec(memory_space=pltpu.MemorySpace.VMEM)


def _per_batch_spec(a):
    """(B, R, K) array -> per-grid-step (R, K) block (batch dim squeezed)."""
    return pl.BlockSpec((None,) + tuple(a.shape[1:]), lambda b: (b, 0, 0))


def _whole_spec(a):
    """Whole 2-D array every grid step (weights / packed bias-scale-shift)."""
    return pl.BlockSpec(tuple(a.shape), lambda b: (0, 0))


# --------------------------------------------------------------------------
# Pallas kernels
# --------------------------------------------------------------------------
def _make_stage_kernel(eda_gap):
    """Per-batch block: spec conv stage + eda conv stage, fully fused.

    spec:  im2col matmul + bias + ReLU + BN affine + maxpool(2x2)  (4 row blocks)
    eda :  im2col matmul + bias + ReLU [+ id BN]  + maxpool(2)     (2 row blocks)
           [+ global average pool when eda_gap]
    """
    def kernel(scols_ref, sw_ref, seps_ref, ecols_ref, ew_ref, eeps_ref,
               so_ref, eo_ref):
        # ---- spec stage: Conv -> ReLU -> BN -> MaxPool2d(2) ----
        y = jnp.dot(scols_ref[...], sw_ref[...], preferred_element_type=jnp.float32)
        y = jnp.maximum(y + seps_ref[0:1, :], 0.0) * seps_ref[1:2, :] + seps_ref[2:3, :]
        r = y.shape[0] // 4
        p = jnp.maximum(jnp.maximum(y[0:r], y[r:2 * r]),
                        jnp.maximum(y[2 * r:3 * r], y[3 * r:4 * r]))
        so_ref[...] = p.astype(so_ref.dtype)

        # ---- eda stage: Conv -> ReLU -> MaxPool1d(2) (BN slot is identity) ----
        z = jnp.dot(ecols_ref[...], ew_ref[...], preferred_element_type=jnp.float32)
        z = jnp.maximum(z + eeps_ref[0:1, :], 0.0) * eeps_ref[1:2, :] + eeps_ref[2:3, :]
        r2 = z.shape[0] // 2
        q = jnp.maximum(z[0:r2], z[r2:2 * r2])
        if eda_gap:                                   # fused AdaptiveAvgPool1d(1)
            eo_ref[...] = jnp.sum(q, axis=0, keepdims=True) * (1.0 / q.shape[0])
        else:
            eo_ref[...] = q.astype(eo_ref.dtype)
    return kernel


def _tail_kernel(scols_ref, sw_ref, seps_ref, gmat_ref, eda_ref,
                 x_ref, wg_ref, bg_ref, w1_ref, b1_ref, w2_ref, b2_ref,
                 hw_ref, hb_ref, o_ref):
    """spec stage 3 (+GAP via averaging matmul) + single-step LSTM
    (h0=c0=0, forget gate dropped) + relu(fc1)/relu(fc2) + fully folded
    fusion MLP / arousal+valence heads (single (384,2) weight)."""
    # ---- spec stage 3: conv + ReLU + BN + maxpool (quadrant-major rows) ----
    y = jnp.dot(scols_ref[...], sw_ref[...], preferred_element_type=jnp.float32)
    y = jnp.maximum(y + seps_ref[0:1, :], 0.0) * seps_ref[1:2, :] + seps_ref[2:3, :]
    r = y.shape[0] // 4
    p = jnp.maximum(jnp.maximum(y[0:r], y[r:2 * r]),
                    jnp.maximum(y[2 * r:3 * r], y[3 * r:4 * r]))      # (B*g, 128)
    # GAP as one tiny matmul against a precomputed block-averaging matrix.
    spec_feat = jnp.dot(gmat_ref[...], p, preferred_element_type=jnp.float32)  # (B,128)

    # ---- music: single-step LSTM, gate blocks zero-padded to 256 lanes ----
    xb = x_ref[...].astype(jnp.bfloat16)
    g = jnp.dot(xb, wg_ref[...], preferred_element_type=jnp.float32) + bg_ref[...]
    i = jax.nn.sigmoid(g[:, 0:256])
    c = i * jnp.tanh(g[:, 256:512])
    h = jax.nn.sigmoid(g[:, 512:768]) * jnp.tanh(c)                   # (B, 256)
    m = jnp.maximum(jnp.dot(h.astype(jnp.bfloat16), w1_ref[...],
                            preferred_element_type=jnp.float32) + b1_ref[...], 0.0)
    m = jnp.maximum(jnp.dot(m.astype(jnp.bfloat16), w2_ref[...],
                            preferred_element_type=jnp.float32) + b2_ref[...], 0.0)

    # ---- fusion: concat expressed as 3 partial dots against the folded weight
    heads = (jnp.dot(spec_feat, hw_ref[0:128], preferred_element_type=jnp.float32)
             + jnp.dot(eda_ref[...], hw_ref[128:256], preferred_element_type=jnp.float32)
             + jnp.dot(m, hw_ref[256:384], preferred_element_type=jnp.float32)
             + hb_ref[...])
    o_ref[...] = heads


# --------------------------------------------------------------------------
# XLA-side glue: channels-last im2col with pool-quadrant-major row ordering
# --------------------------------------------------------------------------
def im2col2d(x, batch_major):
    """x: (B, H, W, Cin) NHWC -> im2col rows for conv3x3(pad=1) fused with a
    2x2 maxpool.  batch_major=True -> (B, 4*Ho*Wo, 9*Cin) rows (q, i, j) per
    batch; False -> (4*B*Ho*Wo, 9*Cin) rows (q, b, i, j)."""
    B, H, W, Cin = x.shape
    Ho, Wo = H // 2, W // 2
    xp = jnp.pad(x, ((0, 0), (1, 1), (1, 1), (0, 0)))
    quads = []
    for qy in range(2):
        for qx in range(2):
            taps = []
            for dy in range(3):
                for dx in range(3):
                    s1, s2 = qy + dy, qx + dx
                    win = xp[:, s1:s1 + 2 * Ho - 1:2, s2:s2 + 2 * Wo - 1:2, :]
                    taps.append(win.reshape(B, Ho * Wo, Cin))
            quads.append(jnp.concatenate(taps, axis=-1))       # (B, Ho*Wo, 9Cin)
    if batch_major:
        return jnp.concatenate(quads, axis=1)                  # (B, 4*Ho*Wo, 9Cin)
    return jnp.concatenate([q.reshape(B * Ho * Wo, -1) for q in quads], axis=0)


def im2col1d(x, batch_major):
    """x: (B, L, Cin) NLC -> im2col rows for conv3(pad=1) fused with maxpool(2)."""
    B, L, Cin = x.shape
    Lo = L // 2
    xp = jnp.pad(x, ((0, 0), (1, 1), (0, 0)))
    halves = []
    for q in range(2):
        taps = []
        for d in range(3):
            s = q + d
            taps.append(xp[:, s:s + 2 * Lo - 1:2, :].reshape(B, Lo, Cin))
        halves.append(jnp.concatenate(taps, axis=-1))           # (B, Lo, 3Cin)
    if batch_major:
        return jnp.concatenate(halves, axis=1)                  # (B, 2*Lo, 3Cin)
    return jnp.concatenate([h.reshape(B * Lo, -1) for h in halves], axis=0)


# --------------------------------------------------------------------------
# Launch wrappers
# --------------------------------------------------------------------------
def run_stage_pair(kernel, scols, sw, seps, ecols, ew, eeps,
                   s_out_shape, e_out_shape, e_out_dtype):
    """One pallas_call handling the spec + eda conv stages of the same depth,
    gridded over batch ('parallel' -> both v7x TensorCores, bounded VMEM)."""
    B = scols.shape[0]
    return pl.pallas_call(
        kernel,
        grid=(B,),
        in_specs=[_per_batch_spec(scols), _whole_spec(sw), _whole_spec(seps),
                  _per_batch_spec(ecols), _whole_spec(ew), _whole_spec(eeps)],
        out_specs=(pl.BlockSpec((None,) + s_out_shape[1:], lambda b: (b, 0, 0)),
                   pl.BlockSpec((None,) + e_out_shape[1:], lambda b: (b, 0, 0))),
        out_shape=(jax.ShapeDtypeStruct(s_out_shape, BF16),
                   jax.ShapeDtypeStruct(e_out_shape, e_out_dtype)),
        compiler_params=pltpu.CompilerParams(dimension_semantics=("parallel",)),
    )(scols, sw, seps, ecols, ew, eeps)


def run_tail(kp, scols3, gmat, eda_feat, music_vector):
    B = music_vector.shape[0]
    return pl.pallas_call(
        _tail_kernel,
        out_shape=jax.ShapeDtypeStruct((B, 2), F32),
        in_specs=[_vmem() for _ in range(14)],
        out_specs=_vmem(),
    )(scols3, kp['spec3_w'], kp['spec3_eps'], gmat, eda_feat,
      music_vector, kp['lstm_w'], kp['lstm_b'],
      kp['mfc1_w'], kp['mfc1_b'], kp['mfc2_w'], kp['mfc2_b'],
      kp['head_w'], kp['head_b'])


# --------------------------------------------------------------------------
# Parameters: PyTorch-layout synthetic init + one-time repack for the kernels
# --------------------------------------------------------------------------
def init_params(key):
    keys = iter(jax.random.split(key, 64))

    def nrm(shape, scale):
        return jax.random.normal(next(keys), shape, F32) * scale

    p = {}
    # spec_cnn
    p['spec_conv1_w'] = nrm((64, 1, 3, 3), 0.30)
    p['spec_conv1_b'] = nrm((64,), 0.10)
    p['spec_bn1_g'] = 1.0 + nrm((64,), 0.05)
    p['spec_bn1_b'] = nrm((64,), 0.05)
    p['spec_conv2_w'] = nrm((128, 64, 3, 3), 0.05)
    p['spec_conv2_b'] = nrm((128,), 0.10)
    p['spec_bn2_g'] = 1.0 + nrm((128,), 0.05)
    p['spec_bn2_b'] = nrm((128,), 0.05)
    p['spec_conv3_w'] = nrm((128, 128, 3, 3), 0.03)
    p['spec_conv3_b'] = nrm((128,), 0.10)
    p['spec_bn3_g'] = 1.0 + nrm((128,), 0.05)
    p['spec_bn3_b'] = nrm((128,), 0.05)
    # eda_cnn
    p['eda_conv1_w'] = nrm((64, 1, 3), 0.30)
    p['eda_conv1_b'] = nrm((64,), 0.10)
    p['eda_conv2_w'] = nrm((128, 64, 3), 0.07)
    p['eda_conv2_b'] = nrm((128,), 0.10)
    # music LSTM (input=64, hidden=200, PyTorch gate order i,f,g,o)
    p['lstm_w_ih'] = nrm((800, 64), 0.10)
    p['lstm_b_ih'] = nrm((800,), 0.05)
    p['lstm_b_hh'] = nrm((800,), 0.05)
    # music fcs
    p['music_fc1_w'] = nrm((128, 200), 0.07)
    p['music_fc1_b'] = nrm((128,), 0.05)
    p['music_fc2_w'] = nrm((128, 128), 0.08)
    p['music_fc2_b'] = nrm((128,), 0.05)
    # fusion
    p['fusion_fc1_w'] = nrm((256, 384), 0.05)
    p['fusion_fc1_b'] = nrm((256,), 0.05)
    p['bn1_g'] = 1.0 + nrm((256,), 0.05)
    p['bn1_b'] = nrm((256,), 0.05)
    p['fusion_fc2_w'] = nrm((256, 256), 0.06)
    p['fusion_fc2_b'] = nrm((256,), 0.05)
    p['bn2_g'] = 1.0 + nrm((256,), 0.05)
    p['bn2_b'] = nrm((256,), 0.05)
    # heads
    p['arousal_w'] = nrm((1, 256), 0.06)
    p['arousal_b'] = nrm((1,), 0.05)
    p['valence_w'] = nrm((1, 256), 0.06)
    p['valence_b'] = nrm((1,), 0.05)
    return p


def prepare_params(p):
    """Repack PyTorch-layout params into the layouts the fused kernels eat.
    Large weights -> bf16; bias / BN affine / folded-head tensors stay f32."""
    kp = {}

    def conv2d_pack(w, b, gamma=None, beta=None):
        Cout, Cin = w.shape[0], w.shape[1]
        w_mat = jnp.transpose(w, (2, 3, 1, 0)).reshape(9 * Cin, Cout)
        if gamma is None:
            scale = jnp.ones((Cout,), F32)
            shift = jnp.zeros((Cout,), F32)
        else:
            # Eval-mode BN with fresh running stats (mean=0, var=1).
            scale = gamma / jnp.sqrt(1.0 + BN_EPS)
            shift = beta
        eps = jnp.stack([b, scale, shift], axis=0)                    # (3, Cout)
        return w_mat.astype(BF16), eps.astype(F32)

    def conv1d_pack(w, b):
        Cout, Cin = w.shape[0], w.shape[1]
        w_mat = jnp.transpose(w, (2, 1, 0)).reshape(3 * Cin, Cout)
        eps = jnp.stack([b, jnp.ones((Cout,), F32), jnp.zeros((Cout,), F32)], axis=0)
        return w_mat.astype(BF16), eps.astype(F32)

    kp['spec1_w'], kp['spec1_eps'] = conv2d_pack(
        p['spec_conv1_w'], p['spec_conv1_b'], p['spec_bn1_g'], p['spec_bn1_b'])
    kp['spec2_w'], kp['spec2_eps'] = conv2d_pack(
        p['spec_conv2_w'], p['spec_conv2_b'], p['spec_bn2_g'], p['spec_bn2_b'])
    kp['spec3_w'], kp['spec3_eps'] = conv2d_pack(
        p['spec_conv3_w'], p['spec_conv3_b'], p['spec_bn3_g'], p['spec_bn3_b'])
    kp['eda1_w'], kp['eda1_eps'] = conv1d_pack(p['eda_conv1_w'], p['eda_conv1_b'])
    kp['eda2_w'], kp['eda2_eps'] = conv1d_pack(p['eda_conv2_w'], p['eda_conv2_b'])

    # ---- music: drop forget gate (h0=c0=0), pad each gate block to 256 lanes ----
    Hs = 200
    Wih = p['lstm_w_ih']
    bsum = p['lstm_b_ih'] + p['lstm_b_hh']
    Wi, Wg, Wo = Wih[0:Hs], Wih[2 * Hs:3 * Hs], Wih[3 * Hs:4 * Hs]
    bi, bg, bo = bsum[0:Hs], bsum[2 * Hs:3 * Hs], bsum[3 * Hs:4 * Hs]

    def padw(mT):
        return jnp.pad(mT, ((0, 0), (0, 256 - Hs)))

    kp['lstm_w'] = jnp.concatenate(
        [padw(Wi.T), padw(Wg.T), padw(Wo.T)], axis=1).astype(BF16)      # (64, 768)
    kp['lstm_b'] = jnp.concatenate(
        [jnp.pad(bi, (0, 256 - Hs)), jnp.pad(bg, (0, 256 - Hs)),
         jnp.pad(bo, (0, 256 - Hs))]).reshape(1, 768).astype(F32)
    kp['mfc1_w'] = jnp.pad(p['music_fc1_w'].T, ((0, 256 - Hs), (0, 0))).astype(BF16)
    kp['mfc1_b'] = p['music_fc1_b'].reshape(1, 128).astype(F32)
    kp['mfc2_w'] = p['music_fc2_w'].T.astype(BF16)                      # (128, 128)
    kp['mfc2_b'] = p['music_fc2_b'].reshape(1, 128).astype(F32)

    # ---- fusion: fc1 -> BN1 -> fc2 -> BN2 -> heads is purely linear in eval
    # mode, so fold EVERYTHING into one (384, 2) weight + (2,) bias.  Exact. ----
    s1 = p['bn1_g'] / jnp.sqrt(1.0 + BN_EPS)
    s2 = p['bn2_g'] / jnp.sqrt(1.0 + BN_EPS)
    A1 = p['fusion_fc1_w'].T * s1[None, :]                              # (384, 256)
    c1 = p['fusion_fc1_b'] * s1 + p['bn1_b']                            # (256,)
    A2 = p['fusion_fc2_w'].T * s2[None, :]                              # (256, 256)
    c2 = p['fusion_fc2_b'] * s2 + p['bn2_b']                            # (256,)
    Wh = jnp.concatenate([p['arousal_w'].T, p['valence_w'].T], axis=1)  # (256, 2)
    bh = jnp.concatenate([p['arousal_b'], p['valence_b']])              # (2,)
    kp['head_w'] = (A1 @ (A2 @ Wh)).astype(F32)                         # (384, 2)
    kp['head_b'] = ((c1 @ A2 + c2) @ Wh + bh).reshape(1, 2).astype(F32)
    return kp


# --------------------------------------------------------------------------
# Forward pass (3 Pallas launches)
# --------------------------------------------------------------------------
def spectro_eda_net_forward(kp, spectrogram, eda_data, music_vector):
    B, _, H, W = spectrogram.shape
    L = eda_data.shape[2]
    assert H % 8 == 0 and W % 8 == 0 and L % 4 == 0, "spatial dims must survive the pools"

    # ---- input boundary: NCHW/NCL -> channels-last, cast to bf16 once ----
    xs = jnp.transpose(spectrogram, (0, 2, 3, 1)).astype(BF16)          # (B, H, W, 1)
    xe = jnp.transpose(eda_data, (0, 2, 1)).astype(BF16)                # (B, L, 1)

    # ---- L1: spec stage 1 + eda stage 1 ----
    scols1 = im2col2d(xs, batch_major=True)                             # (B, 4*H/2*W/2, 9)
    ecols1 = im2col1d(xe, batch_major=True)                             # (B, 2*L/2, 3)
    s1, e1 = run_stage_pair(
        _make_stage_kernel(eda_gap=False),
        scols1, kp['spec1_w'], kp['spec1_eps'],
        ecols1, kp['eda1_w'], kp['eda1_eps'],
        s_out_shape=(B, (H // 2) * (W // 2), 64),
        e_out_shape=(B, L // 2, 64), e_out_dtype=BF16)

    # ---- L2: spec stage 2 + eda stage 2 (+ eda GAP) ----
    xs2 = s1.reshape(B, H // 2, W // 2, 64)
    scols2 = im2col2d(xs2, batch_major=True)                            # (B, 4*H/4*W/4, 576)
    ecols2 = im2col1d(e1, batch_major=True)                             # (B, 2*L/4, 192)
    s2, egap = run_stage_pair(
        _make_stage_kernel(eda_gap=True),
        scols2, kp['spec2_w'], kp['spec2_eps'],
        ecols2, kp['eda2_w'], kp['eda2_eps'],
        s_out_shape=(B, (H // 4) * (W // 4), 128),
        e_out_shape=(B, 1, 128), e_out_dtype=F32)
    eda_feat = egap.reshape(B, 128)

    # ---- L3: spec stage 3 + GAP + LSTM + music FCs + folded fusion heads ----
    xs3 = s2.reshape(B, H // 4, W // 4, 128)
    scols3 = im2col2d(xs3, batch_major=False)                           # (4*B*g3, 1152)
    g3 = (H // 8) * (W // 8)
    gmat = jnp.asarray(np.kron(np.eye(B, dtype=np.float32),
                               np.full((1, g3), 1.0 / g3, np.float32)))  # (B, B*g3)
    heads = run_tail(kp, scols3, gmat, eda_feat, music_vector)          # (B, 2)
    return heads[:, 0:1], heads[:, 1:2]


# --------------------------------------------------------------------------
if __name__ == "__main__":
    key = jax.random.PRNGKey(0)
    kp_key, k1, k2, k3 = jax.random.split(key, 4)
    params = init_params(kp_key)
    kparams = prepare_params(params)

    B = 2
    spectrogram = jax.random.normal(k1, (B, 1, 16, 16), F32)   # NCHW
    eda_data = jax.random.normal(k2, (B, 1, 16), F32)          # NCL
    music_vector = jax.random.normal(k3, (B, 64), F32)

    fwd = jax.jit(spectro_eda_net_forward)
    arousal, valence = fwd(kparams, spectrogram, eda_data, music_vector)
    jax.block_until_ready((arousal, valence))

    assert arousal.shape == (B, 1) and valence.shape == (B, 1)
    assert bool(jnp.all(jnp.isfinite(arousal))) and bool(jnp.all(jnp.isfinite(valence)))
    print("KERNEL_OK")
</pallas_src>

<mosaic_0001>
module attributes {stable_mosaic.version = 11 : i64} {
  func.func @kernel(%arg0: i32, %arg1: memref<1x256x9xbf16, #tpu.memory_space<vmem>>, %arg2: memref<9x64xbf16, #tpu.memory_space<vmem>>, %arg3: memref<3x64xf32, #tpu.memory_space<vmem>>, %arg4: memref<1x16x3xbf16, #tpu.memory_space<vmem>>, %arg5: memref<3x64xbf16, #tpu.memory_space<vmem>>, %arg6: memref<3x64xf32, #tpu.memory_space<vmem>>, %arg7: memref<1x64x64xbf16, #tpu.memory_space<vmem>>, %arg8: memref<1x8x64xbf16, #tpu.memory_space<vmem>>) attributes {dimension_semantics = [#tpu.dimension_semantics<parallel>], iteration_bounds = array<i64: 2>, scalar_prefetch = 0 : i64, scratch_operands = 0 : i64, tpu.core_type = #tpu.core_type<tc>, window_params = [{transform_indices = @transform_0, window_bounds = array<i64: 1, 256, 9>}, {pipeline_mode = #tpu.pipeline_mode<synchronous>, transform_indices = @transform_1, window_bounds = array<i64: 9, 64>}, {pipeline_mode = #tpu.pipeline_mode<synchronous>, transform_indices = @transform_2, window_bounds = array<i64: 3, 64>}, {transform_indices = @transform_3, window_bounds = array<i64: 1, 16, 3>}, {pipeline_mode = #tpu.pipeline_mode<synchronous>, transform_indices = @transform_4, window_bounds = array<i64: 3, 64>}, {pipeline_mode = #tpu.pipeline_mode<synchronous>, transform_indices = @transform_5, window_bounds = array<i64: 3, 64>}, {transform_indices = @transform_6, window_bounds = array<i64: 1, 64, 64>}, {transform_indices = @transform_7, window_bounds = array<i64: 1, 8, 64>}]} {
    %c0 = arith.constant 0 : index
    %c0_0 = arith.constant 0 : index
    %c0_1 = arith.constant 0 : index
    %0 = vector.load %arg1[%c0, %c0_0, %c0_1] : memref<1x256x9xbf16, #tpu.memory_space<vmem>>, vector<1x256x9xbf16>
    %1 = vector.shape_cast %0 : vector<1x256x9xbf16> to vector<256x9xbf16>
    %c0_2 = arith.constant 0 : index
    %c0_3 = arith.constant 0 : index
    %2 = vector.load %arg2[%c0_2, %c0_3] : memref<9x64xbf16, #tpu.memory_space<vmem>>, vector<9x64xbf16>
    %cst = arith.constant dense<0.000000e+00> : vector<256x64xf32>
    %3 = tpu.matmul %1, %2, %cst {dimension_numbers = #tpu.dot_dimension_numbers<[1], [0], [0], [1], [0, 0, 1, 1], [], []>} : vector<256x9xbf16>, vector<9x64xbf16>, vector<256x64xf32> -> vector<256x64xf32>
    %c0_4 = arith.constant 0 : index
    %c0_5 = arith.constant 0 : index
    %4 = vector.load %arg3[%c0_4, %c0_5] : memref<3x64xf32, #tpu.memory_space<vmem>>, vector<1x64xf32>
    %5 = vector.broadcast %4 : vector<1x64xf32> to vector<256x64xf32>
    %6 = arith.addf %3, %5 : vector<256x64xf32>
    %cst_6 = arith.constant 0.000000e+00 : f32
    %7 = vector.broadcast %cst_6 : f32 to vector<256x64xf32>
    %8 = arith.maximumf %6, %7 : vector<256x64xf32>
    %c1 = arith.constant 1 : index
    %c0_7 = arith.constant 0 : index
    %9 = vector.load %arg3[%c1, %c0_7] : memref<3x64xf32, #tpu.memory_space<vmem>>, vector<1x64xf32>
    %10 = vector.broadcast %9 : vector<1x64xf32> to vector<256x64xf32>
    %11 = arith.mulf %8, %10 : vector<256x64xf32>
    %c2 = arith.constant 2 : index
    %c0_8 = arith.constant 0 : index
    %12 = vector.load %arg3[%c2, %c0_8] : memref<3x64xf32, #tpu.memory_space<vmem>>, vector<1x64xf32>
    %13 = vector.broadcast %12 : vector<1x64xf32> to vector<256x64xf32>
    %14 = arith.addf %11, %13 : vector<256x64xf32>
    %15 = vector.extract_strided_slice %14 {offsets = [0, 0], sizes = [64, 64], strides = [1, 1]} : vector<256x64xf32> to vector<64x64xf32>
    %16 = vector.extract_strided_slice %14 {offsets = [64, 0], sizes = [64, 64], strides = [1, 1]} : vector<256x64xf32> to vector<64x64xf32>
    %17 = arith.maximumf %15, %16 : vector<64x64xf32>
    %18 = vector.extract_strided_slice %14 {offsets = [128, 0], sizes = [64, 64], strides = [1, 1]} : vector<256x64xf32> to vector<64x64xf32>
    %19 = vector.extract_strided_slice %14 {offsets = [192, 0], sizes = [64, 64], strides = [1, 1]} : vector<256x64xf32> to vector<64x64xf32>
    %20 = arith.maximumf %18, %19 : vector<64x64xf32>
    %21 = arith.maximumf %17, %20 : vector<64x64xf32>
    %22 = arith.truncf %21 : vector<64x64xf32> to vector<64x64xbf16>
    %c0_9 = arith.constant 0 : index
    %c0_10 = arith.constant 0 : index
    %c0_11 = arith.constant 0 : index
    %23 = vector.load %arg7[%c0_9, %c0_10, %c0_11] : memref<1x64x64xbf16, #tpu.memory_space<vmem>>, vector<1x64x64xbf16>
    %24 = vector.shape_cast %23 : vector<1x64x64xbf16> to vector<64x64xbf16>
    %25 = vector.shape_cast %22 : vector<64x64xbf16> to vector<1x64x64xbf16>
    tpu.vector_store %arg7[%c0_9, %c0_10, %c0_11], %25 {strides = array<i32>} : memref<1x64x64xbf16, #tpu.memory_space<vmem>>, vector<1x64x64xbf16>,
    %c0_12 = arith.constant 0 : index
    %c0_13 = arith.constant 0 : index
    %c0_14 = arith.constant 0 : index
    %26 = vector.load %arg4[%c0_12, %c0_13, %c0_14] : memref<1x16x3xbf16, #tpu.memory_space<vmem>>, vector<1x16x3xbf16>
    %27 = vector.shape_cast %26 : vector<1x16x3xbf16> to vector<16x3xbf16>
    %c0_15 = arith.constant 0 : index
    %c0_16 = arith.constant 0 : index
    %28 = vector.load %arg5[%c0_15, %c0_16] : memref<3x64xbf16, #tpu.memory_space<vmem>>, vector<3x64xbf16>
    %cst_17 = arith.constant dense<0.000000e+00> : vector<16x64xf32>
    %29 = tpu.matmul %27, %28, %cst_17 {dimension_numbers = #tpu.dot_dimension_numbers<[1], [0], [0], [1], [0, 0, 1, 1], [], []>} : vector<16x3xbf16>, vector<3x64xbf16>, vector<16x64xf32> -> vector<16x64xf32>
    %c0_18 = arith.constant 0 : index
    %c0_19 = arith.constant 0 : index
    %30 = vector.load %arg6[%c0_18, %c0_19] : memref<3x64xf32, #tpu.memory_space<vmem>>, vector<1x64xf32>
    %31 = vector.broadcast %30 : vector<1x64xf32> to vector<16x64xf32>
    %32 = arith.addf %29, %31 : vector<16x64xf32>
    %cst_20 = arith.constant 0.000000e+00 : f32
    %33 = vector.broadcast %cst_20 : f32 to vector<16x64xf32>
    %34 = arith.maximumf %32, %33 : vector<16x64xf32>
    %c1_21 = arith.constant 1 : index
    %c0_22 = arith.constant 0 : index
    %35 = vector.load %arg6[%c1_21, %c0_22] : memref<3x64xf32, #tpu.memory_space<vmem>>, vector<1x64xf32>
    %36 = vector.broadcast %35 : vector<1x64xf32> to vector<16x64xf32>
    %37 = arith.mulf %34, %36 : vector<16x64xf32>
    %c2_23 = arith.constant 2 : index
    %c0_24 = arith.constant 0 : index
    %38 = vector.load %arg6[%c2_23, %c0_24] : memref<3x64xf32, #tpu.memory_space<vmem>>, vector<1x64xf32>
    %39 = vector.broadcast %38 : vector<1x64xf32> to vector<16x64xf32>
    %40 = arith.addf %37, %39 : vector<16x64xf32>
    %41 = vector.extract_strided_slice %40 {offsets = [0, 0], sizes = [8, 64], strides = [1, 1]} : vector<16x64xf32> to vector<8x64xf32>
    %42 = vector.extract_strided_slice %40 {offsets = [8, 0], sizes = [8, 64], strides = [1, 1]} : vector<16x64xf32> to vector<8x64xf32>
    %43 = arith.maximumf %41, %42 : vector<8x64xf32>
    %44 = arith.truncf %43 : vector<8x64xf32> to vector<8x64xbf16>
    %c0_25 = arith.constant 0 : index
    %c0_26 = arith.constant 0 : index
    %c0_27 = arith.constant 0 : index
    %45 = vector.load %arg8[%c0_25, %c0_26, %c0_27] : memref<1x8x64xbf16, #tpu.memory_space<vmem>>, vector<1x8x64xbf16>
    %46 = vector.shape_cast %45 : vector<1x8x64xbf16> to vector<8x64xbf16>
    %47 = vector.shape_cast %44 : vector<8x64xbf16> to vector<1x8x64xbf16>
    tpu.vector_store %arg8[%c0_25, %c0_26, %c0_27], %47 {strides = array<i32>} : memref<1x8x64xbf16, #tpu.memory_space<vmem>>, vector<1x8x64xbf16>,
    return
  }
  func.func @transform_0(%arg0: i32) -> (i32, i32, i32) {
    %c0_i32 = arith.constant 0 : i32
    %c0_i32_0 = arith.constant 0 : i32
    %c0_i32_1 = arith.constant 0 : i32
    return %arg0, %c0_i32, %c0_i32_0 : i32, i32, i32
  }
  func.func @transform_1(%arg0: i32) -> (i32, i32) {
    %c0_i32 = arith.constant 0 : i32
    %c0_i32_0 = arith.constant 0 : i32
    %c0_i32_1 = arith.constant 0 : i32
    return %c0_i32, %c0_i32_0 : i32, i32
  }
  func.func @transform_2(%arg0: i32) -> (i32, i32) {
    %c0_i32 = arith.constant 0 : i32
    %c0_i32_0 = arith.constant 0 : i32
    %c0_i32_1 = arith.constant 0 : i32
    return %c0_i32, %c0_i32_0 : i32, i32
  }
  func.func @transform_3(%arg0: i32) -> (i32, i32, i32) {
    %c0_i32 = arith.constant 0 : i32
    %c0_i32_0 = arith.constant 0 : i32
    %c0_i32_1 = arith.constant 0 : i32
    return %arg0, %c0_i32, %c0_i32_0 : i32, i32, i32
  }
  func.func @transform_4(%arg0: i32) -> (i32, i32) {
    %c0_i32 = arith.constant 0 : i32
    %c0_i32_0 = arith.constant 0 : i32
    %c0_i32_1 = arith.constant 0 : i32
    return %c0_i32, %c0_i32_0 : i32, i32
  }
  func.func @transform_5(%arg0: i32) -> (i32, i32) {
    %c0_i32 = arith.constant 0 : i32
    %c0_i32_0 = arith.constant 0 : i32
    %c0_i32_1 = arith.constant 0 : i32
    return %c0_i32, %c0_i32_0 : i32, i32
  }
  func.func @transform_6(%arg0: i32) -> (i32, i32, i32) {
    %c0_i32 = arith.constant 0 : i32
    %c0_i32_0 = arith.constant 0 : i32
    %c0_i32_1 = arith.constant 0 : i32
    return %arg0, %c0_i32, %c0_i32_0 : i32, i32, i32
  }
  func.func @transform_7(%arg0: i32) -> (i32, i32, i32) {
    %c0_i32 = arith.constant 0 : i32
    %c0_i32_0 = arith.constant 0 : i32
    %c0_i32_1 = arith.constant 0 : i32
    return %arg0, %c0_i32, %c0_i32_0 : i32, i32, i32
  }
}

module attributes {stable_mosaic.version = 11 : i64} {
  func.func @kernel(%arg0: i32, %arg1: memref<1x64x576xbf16, #tpu.memory_space<vmem>>, %arg2: memref<576x128xbf16, #tpu.memory_space<vmem>>, %arg3: memref<3x128xf32, #tpu.memory_space<vmem>>, %arg4: memref<1x8x192xbf16, #tpu.memory_space<vmem>>, %arg5: memref<192x128xbf16, #tpu.memory_space<vmem>>, %arg6: memref<3x128xf32, #tpu.memory_space<vmem>>, %arg7: memref<1x16x128xbf16, #tpu.memory_space<vmem>>, %arg8: memref<1x1x128xf32, #tpu.memory_space<vmem>>) attributes {dimension_semantics = [#tpu.dimension_semantics<parallel>], iteration_bounds = array<i64: 2>, scalar_prefetch = 0 : i64, scratch_operands = 0 : i64, tpu.core_type = #tpu.core_type<tc>, window_params = [{transform_indices = @transform_0, window_bounds = array<i64: 1, 64, 576>}, {pipeline_mode = #tpu.pipeline_mode<synchronous>, transform_indices = @transform_1, window_bounds = array<i64: 576, 128>}, {pipeline_mode = #tpu.pipeline_mode<synchronous>, transform_indices = @transform_2, window_bounds = array<i64: 3, 128>}, {transform_indices = @transform_3, window_bounds = array<i64: 1, 8, 192>}, {pipeline_mode = #tpu.pipeline_mode<synchronous>, transform_indices = @transform_4, window_bounds = array<i64: 192, 128>}, {pipeline_mode = #tpu.pipeline_mode<synchronous>, transform_indices = @transform_5, window_bounds = array<i64: 3, 128>}, {transform_indices = @transform_6, window_bounds = array<i64: 1, 16, 128>}, {transform_indices = @transform_7, window_bounds = array<i64: 1, 1, 128>}]} {
    %c0 = arith.constant 0 : index
    %c0_0 = arith.constant 0 : index
    %c0_1 = arith.constant 0 : index
    %0 = vector.load %arg1[%c0, %c0_0, %c0_1] : memref<1x64x576xbf16, #tpu.memory_space<vmem>>, vector<1x64x576xbf16>
    %1 = vector.shape_cast %0 : vector<1x64x576xbf16> to vector<64x576xbf16>
    %c0_2 = arith.constant 0 : index
    %c0_3 = arith.constant 0 : index
    %2 = vector.load %arg2[%c0_2, %c0_3] : memref<576x128xbf16, #tpu.memory_space<vmem>>, vector<576x128xbf16>
    %cst = arith.constant dense<0.000000e+00> : vector<64x128xf32>
    %3 = tpu.matmul %1, %2, %cst {dimension_numbers = #tpu.dot_dimension_numbers<[1], [0], [0], [1], [0, 0, 1, 1], [], []>} : vector<64x576xbf16>, vector<576x128xbf16>, vector<64x128xf32> -> vector<64x128xf32>
    %c0_4 = arith.constant 0 : index
    %c0_5 = arith.constant 0 : index
    %4 = vector.load %arg3[%c0_4, %c0_5] : memref<3x128xf32, #tpu.memory_space<vmem>>, vector<1x128xf32>
    %5 = vector.broadcast %4 : vector<1x128xf32> to vector<64x128xf32>
    %6 = arith.addf %3, %5 : vector<64x128xf32>
    %cst_6 = arith.constant 0.000000e+00 : f32
    %7 = vector.broadcast %cst_6 : f32 to vector<64x128xf32>
    %8 = arith.maximumf %6, %7 : vector<64x128xf32>
    %c1 = arith.constant 1 : index
    %c0_7 = arith.constant 0 : index
    %9 = vector.load %arg3[%c1, %c0_7] : memref<3x128xf32, #tpu.memory_space<vmem>>, vector<1x128xf32>
    %10 = vector.broadcast %9 : vector<1x128xf32> to vector<64x128xf32>
    %11 = arith.mulf %8, %10 : vector<64x128xf32>
    %c2 = arith.constant 2 : index
    %c0_8 = arith.constant 0 : index
    %12 = vector.load %arg3[%c2, %c0_8] : memref<3x128xf32, #tpu.memory_space<vmem>>, vector<1x128xf32>
    %13 = vector.broadcast %12 : vector<1x128xf32> to vector<64x128xf32>
    %14 = arith.addf %11, %13 : vector<64x128xf32>
    %15 = vector.extract_strided_slice %14 {offsets = [0, 0], sizes = [16, 128], strides = [1, 1]} : vector<64x128xf32> to vector<16x128xf32>
    %16 = vector.extract_strided_slice %14 {offsets = [16, 0], sizes = [16, 128], strides = [1, 1]} : vector<64x128xf32> to vector<16x128xf32>
    %17 = arith.maximumf %15, %16 : vector<16x128xf32>
    %18 = vector.extract_strided_slice %14 {offsets = [32, 0], sizes = [16, 128], strides = [1, 1]} : vector<64x128xf32> to vector<16x128xf32>
    %19 = vector.extract_strided_slice %14 {offsets = [48, 0], sizes = [16, 128], strides = [1, 1]} : vector<64x128xf32> to vector<16x128xf32>
    %20 = arith.maximumf %18, %19 : vector<16x128xf32>
    %21 = arith.maximumf %17, %20 : vector<16x128xf32>
    %22 = arith.truncf %21 : vector<16x128xf32> to vector<16x128xbf16>
    %c0_9 = arith.constant 0 : index
    %c0_10 = arith.constant 0 : index
    %c0_11 = arith.constant 0 : index
    %23 = vector.load %arg7[%c0_9, %c0_10, %c0_11] : memref<1x16x128xbf16, #tpu.memory_space<vmem>>, vector<1x16x128xbf16>
    %24 = vector.shape_cast %23 : vector<1x16x128xbf16> to vector<16x128xbf16>
    %25 = vector.shape_cast %22 : vector<16x128xbf16> to vector<1x16x128xbf16>
    tpu.vector_store %arg7[%c0_9, %c0_10, %c0_11], %25 {strides = array<i32>} : memref<1x16x128xbf16, #tpu.memory_space<vmem>>, vector<1x16x128xbf16>,
    %c0_12 = arith.constant 0 : index
    %c0_13 = arith.constant 0 : index
    %c0_14 = arith.constant 0 : index
    %26 = vector.load %arg4[%c0_12, %c0_13, %c0_14] : memref<1x8x192xbf16, #tpu.memory_space<vmem>>, vector<1x8x192xbf16>
    %27 = vector.shape_cast %26 : vector<1x8x192xbf16> to vector<8x192xbf16>
    %c0_15 = arith.constant 0 : index
    %c0_16 = arith.constant 0 : index
    %28 = vector.load %arg5[%c0_15, %c0_16] : memref<192x128xbf16, #tpu.memory_space<vmem>>, vector<192x128xbf16>
    %cst_17 = arith.constant dense<0.000000e+00> : vector<8x128xf32>
    %29 = tpu.matmul %27, %28, %cst_17 {dimension_numbers = #tpu.dot_dimension_numbers<[1], [0], [0], [1], [0, 0, 1, 1], [], []>} : vector<8x192xbf16>, vector<192x128xbf16>, vector<8x128xf32> -> vector<8x128xf32>
    %c0_18 = arith.constant 0 : index
    %c0_19 = arith.constant 0 : index
    %30 = vector.load %arg6[%c0_18, %c0_19] : memref<3x128xf32, #tpu.memory_space<vmem>>, vector<1x128xf32>
    %31 = vector.broadcast %30 : vector<1x128xf32> to vector<8x128xf32>
    %32 = arith.addf %29, %31 : vector<8x128xf32>
    %cst_20 = arith.constant 0.000000e+00 : f32
    %33 = vector.broadcast %cst_20 : f32 to vector<8x128xf32>
    %34 = arith.maximumf %32, %33 : vector<8x128xf32>
    %c1_21 = arith.constant 1 : index
    %c0_22 = arith.constant 0 : index
    %35 = vector.load %arg6[%c1_21, %c0_22] : memref<3x128xf32, #tpu.memory_space<vmem>>, vector<1x128xf32>
    %36 = vector.broadcast %35 : vector<1x128xf32> to vector<8x128xf32>
    %37 = arith.mulf %34, %36 : vector<8x128xf32>
    %c2_23 = arith.constant 2 : index
    %c0_24 = arith.constant 0 : index
    %38 = vector.load %arg6[%c2_23, %c0_24] : memref<3x128xf32, #tpu.memory_space<vmem>>, vector<1x128xf32>
    %39 = vector.broadcast %38 : vector<1x128xf32> to vector<8x128xf32>
    %40 = arith.addf %37, %39 : vector<8x128xf32>
    %41 = vector.extract_strided_slice %40 {offsets = [0, 0], sizes = [4, 128], strides = [1, 1]} : vector<8x128xf32> to vector<4x128xf32>
    %42 = vector.extract_strided_slice %40 {offsets = [4, 0], sizes = [4, 128], strides = [1, 1]} : vector<8x128xf32> to vector<4x128xf32>
    %43 = arith.maximumf %41, %42 : vector<4x128xf32>
    %cst_25 = arith.constant dense<0.000000e+00> : vector<128xf32>
    %44 = vector.multi_reduction <add>, %43, %cst_25 [0] : vector<4x128xf32> to vector<128xf32>
    %45 = vector.shape_cast %44 : vector<128xf32> to vector<1x128xf32>
    %cst_26 = arith.constant 2.500000e-01 : f32
    %46 = vector.broadcast %cst_26 : f32 to vector<1x128xf32>
    %47 = arith.mulf %45, %46 : vector<1x128xf32>
    %c0_27 = arith.constant 0 : index
    %c0_28 = arith.constant 0 : index
    %c0_29 = arith.constant 0 : index
    %48 = vector.load %arg8[%c0_27, %c0_28, %c0_29] : memref<1x1x128xf32, #tpu.memory_space<vmem>>, vector<1x1x128xf32>
    %49 = vector.shape_cast %48 : vector<1x1x128xf32> to vector<1x128xf32>
    %50 = vector.shape_cast %47 : vector<1x128xf32> to vector<1x1x128xf32>
    tpu.vector_store %arg8[%c0_27, %c0_28, %c0_29], %50 {strides = array<i32>} : memref<1x1x128xf32, #tpu.memory_space<vmem>>, vector<1x1x128xf32>,
    return
  }
  func.func @transform_0(%arg0: i32) -> (i32, i32, i32) {
    %c0_i32 = arith.constant 0 : i32
    %c0_i32_0 = arith.constant 0 : i32
    %c0_i32_1 = arith.constant 0 : i32
    return %arg0, %c0_i32, %c0_i32_0 : i32, i32, i32
  }
  func.func @transform_1(%arg0: i32) -> (i32, i32) {
    %c0_i32 = arith.constant 0 : i32
    %c0_i32_0 = arith.constant 0 : i32
    %c0_i32_1 = arith.constant 0 : i32
    return %c0_i32, %c0_i32_0 : i32, i32
  }
  func.func @transform_2(%arg0: i32) -> (i32, i32) {
    %c0_i32 = arith.constant 0 : i32
    %c0_i32_0 = arith.constant 0 : i32
    %c0_i32_1 = arith.constant 0 : i32
    return %c0_i32, %c0_i32_0 : i32, i32
  }
  func.func @transform_3(%arg0: i32) -> (i32, i32, i32) {
    %c0_i32 = arith.constant 0 : i32
    %c0_i32_0 = arith.constant 0 : i32
    %c0_i32_1 = arith.constant 0 : i32
    return %arg0, %c0_i32, %c0_i32_0 : i32, i32, i32
  }
  func.func @transform_4(%arg0: i32) -> (i32, i32) {
    %c0_i32 = arith.constant 0 : i32
    %c0_i32_0 = arith.constant 0 : i32
    %c0_i32_1 = arith.constant 0 : i32
    return %c0_i32, %c0_i32_0 : i32, i32
  }
  func.func @transform_5(%arg0: i32) -> (i32, i32) {
    %c0_i32 = arith.constant 0 : i32
    %c0_i32_0 = arith.constant 0 : i32
    %c0_i32_1 = arith.constant 0 : i32
    return %c0_i32, %c0_i32_0 : i32, i32
  }
  func.func @transform_6(%arg0: i32) -> (i32, i32, i32) {
    %c0_i32 = arith.constant 0 : i32
    %c0_i32_0 = arith.constant 0 : i32
    %c0_i32_1 = arith.constant 0 : i32
    return %arg0, %c0_i32, %c0_i32_0 : i32, i32, i32
  }
  func.func @transform_7(%arg0: i32) -> (i32, i32, i32) {
    %c0_i32 = arith.constant 0 : i32
    %c0_i32_0 = arith.constant 0 : i32
    %c0_i32_1 = arith.constant 0 : i32
    return %arg0, %c0_i32, %c0_i32_0 : i32, i32, i32
  }
}

module attributes {stable_mosaic.version = 11 : i64} {
  func.func @_tail_kernel(%arg0: memref<32x1152xbf16, #tpu.memory_space<vmem>>, %arg1: memref<1152x128xbf16, #tpu.memory_space<vmem>>, %arg2: memref<3x128xf32, #tpu.memory_space<vmem>>, %arg3: memref<2x8xf32, #tpu.memory_space<vmem>>, %arg4: memref<2x128xf32, #tpu.memory_space<vmem>>, %arg5: memref<2x64xf32, #tpu.memory_space<vmem>>, %arg6: memref<64x768xbf16, #tpu.memory_space<vmem>>, %arg7: memref<1x768xf32, #tpu.memory_space<vmem>>, %arg8: memref<256x128xbf16, #tpu.memory_space<vmem>>, %arg9: memref<1x128xf32, #tpu.memory_space<vmem>>, %arg10: memref<128x128xbf16, #tpu.memory_space<vmem>>, %arg11: memref<1x128xf32, #tpu.memory_space<vmem>>, %arg12: memref<384x2xf32, #tpu.memory_space<vmem>>, %arg13: memref<1x2xf32, #tpu.memory_space<vmem>>, %arg14: memref<2x2xf32, #tpu.memory_space<vmem>>) attributes {dimension_semantics = [], scalar_prefetch = 0 : i64, scratch_operands = 0 : i64, tpu.core_type = #tpu.core_type<tc>} {
    %c0 = arith.constant 0 : index
    %c0_0 = arith.constant 0 : index
    %0 = vector.load %arg0[%c0, %c0_0] : memref<32x1152xbf16, #tpu.memory_space<vmem>>, vector<32x1152xbf16>
    %c0_1 = arith.constant 0 : index
    %c0_2 = arith.constant 0 : index
    %1 = vector.load %arg1[%c0_1, %c0_2] : memref<1152x128xbf16, #tpu.memory_space<vmem>>, vector<1152x128xbf16>
    %cst = arith.constant dense<0.000000e+00> : vector<32x128xf32>
    %2 = tpu.matmul %0, %1, %cst {dimension_numbers = #tpu.dot_dimension_numbers<[1], [0], [0], [1], [0, 0, 1, 1], [], []>} : vector<32x1152xbf16>, vector<1152x128xbf16>, vector<32x128xf32> -> vector<32x128xf32>
    %c0_3 = arith.constant 0 : index
    %c0_4 = arith.constant 0 : index
    %3 = vector.load %arg2[%c0_3, %c0_4] : memref<3x128xf32, #tpu.memory_space<vmem>>, vector<1x128xf32>
    %4 = vector.broadcast %3 : vector<1x128xf32> to vector<32x128xf32>
    %5 = arith.addf %2, %4 : vector<32x128xf32>
    %cst_5 = arith.constant 0.000000e+00 : f32
    %6 = vector.broadcast %cst_5 : f32 to vector<32x128xf32>
    %7 = arith.maximumf %5, %6 : vector<32x128xf32>
    %c1 = arith.constant 1 : index
    %c0_6 = arith.constant 0 : index
    %8 = vector.load %arg2[%c1, %c0_6] : memref<3x128xf32, #tpu.memory_space<vmem>>, vector<1x128xf32>
    %9 = vector.broadcast %8 : vector<1x128xf32> to vector<32x128xf32>
    %10 = arith.mulf %7, %9 : vector<32x128xf32>
    %c2 = arith.constant 2 : index
    %c0_7 = arith.constant 0 : index
    %11 = vector.load %arg2[%c2, %c0_7] : memref<3x128xf32, #tpu.memory_space<vmem>>, vector<1x128xf32>
    %12 = vector.broadcast %11 : vector<1x128xf32> to vector<32x128xf32>
    %13 = arith.addf %10, %12 : vector<32x128xf32>
    %14 = vector.extract_strided_slice %13 {offsets = [0, 0], sizes = [8, 128], strides = [1, 1]} : vector<32x128xf32> to vector<8x128xf32>
    %15 = vector.extract_strided_slice %13 {offsets = [8, 0], sizes = [8, 128], strides = [1, 1]} : vector<32x128xf32> to vector<8x128xf32>
    %16 = arith.maximumf %14, %15 : vector<8x128xf32>
    %17 = vector.extract_strided_slice %13 {offsets = [16, 0], sizes = [8, 128], strides = [1, 1]} : vector<32x128xf32> to vector<8x128xf32>
    %18 = vector.extract_strided_slice %13 {offsets = [24, 0], sizes = [8, 128], strides = [1, 1]} : vector<32x128xf32> to vector<8x128xf32>
    %19 = arith.maximumf %17, %18 : vector<8x128xf32>
    %20 = arith.maximumf %16, %19 : vector<8x128xf32>
    %c0_8 = arith.constant 0 : index
    %c0_9 = arith.constant 0 : index
    %21 = vector.load %arg3[%c0_8, %c0_9] : memref<2x8xf32, #tpu.memory_space<vmem>>, vector<2x8xf32>
    %cst_10 = arith.constant dense<0.000000e+00> : vector<2x128xf32>
    %22 = tpu.matmul %21, %20, %cst_10 {dimension_numbers = #tpu.dot_dimension_numbers<[1], [0], [0], [1], [0, 0, 1, 1], [], []>} : vector<2x8xf32>, vector<8x128xf32>, vector<2x128xf32> -> vector<2x128xf32>
    %c0_11 = arith.constant 0 : index
    %c0_12 = arith.constant 0 : index
    %23 = vector.load %arg5[%c0_11, %c0_12] : memref<2x64xf32, #tpu.memory_space<vmem>>, vector<2x64xf32>
    %24 = arith.truncf %23 : vector<2x64xf32> to vector<2x64xbf16>
    %c0_13 = arith.constant 0 : index
    %c0_14 = arith.constant 0 : index
    %25 = vector.load %arg6[%c0_13, %c0_14] : memref<64x768xbf16, #tpu.memory_space<vmem>>, vector<64x768xbf16>
    %cst_15 = arith.constant dense<0.000000e+00> : vector<2x768xf32>
    %26 = tpu.matmul %24, %25, %cst_15 {dimension_numbers = #tpu.dot_dimension_numbers<[1], [0], [0], [1], [0, 0, 1, 1], [], []>} : vector<2x64xbf16>, vector<64x768xbf16>, vector<2x768xf32> -> vector<2x768xf32>
    %c0_16 = arith.constant 0 : index
    %c0_17 = arith.constant 0 : index
    %27 = vector.load %arg7[%c0_16, %c0_17] : memref<1x768xf32, #tpu.memory_space<vmem>>, vector<1x768xf32>
    %28 = vector.broadcast %27 : vector<1x768xf32> to vector<2x768xf32>
    %29 = arith.addf %26, %28 : vector<2x768xf32>
    %30 = vector.extract_strided_slice %29 {offsets = [0, 0], sizes = [2, 256], strides = [1, 1]} : vector<2x768xf32> to vector<2x256xf32>
    %31 = arith.negf %30 : vector<2x256xf32>
    %32 = math.exp %31 : vector<2x256xf32>
    %cst_18 = arith.constant 1.000000e+00 : f32
    %33 = vector.broadcast %cst_18 : f32 to vector<2x256xf32>
    %34 = arith.addf %33, %32 : vector<2x256xf32>
    %35 = arith.divf %33, %34 : vector<2x256xf32>
    %36 = vector.extract_strided_slice %29 {offsets = [0, 256], sizes = [2, 256], strides = [1, 1]} : vector<2x768xf32> to vector<2x256xf32>
    %37 = math.tanh %36 : vector<2x256xf32>
    %38 = arith.mulf %35, %37 : vector<2x256xf32>
    %39 = vector.extract_strided_slice %29 {offsets = [0, 512], sizes = [2, 256], strides = [1, 1]} : vector<2x768xf32> to vector<2x256xf32>
    %40 = arith.negf %39 : vector<2x256xf32>
    %41 = math.exp %40 : vector<2x256xf32>
    %cst_19 = arith.constant 1.000000e+00 : f32
    %42 = vector.broadcast %cst_19 : f32 to vector<2x256xf32>
    %43 = arith.addf %42, %41 : vector<2x256xf32>
    %44 = arith.divf %42, %43 : vector<2x256xf32>
    %45 = math.tanh %38 : vector<2x256xf32>
    %46 = arith.mulf %44, %45 : vector<2x256xf32>
    %47 = arith.truncf %46 : vector<2x256xf32> to vector<2x256xbf16>
    %c0_20 = arith.constant 0 : index
    %c0_21 = arith.constant 0 : index
    %48 = vector.load %arg8[%c0_20, %c0_21] : memref<256x128xbf16, #tpu.memory_space<vmem>>, vector<256x128xbf16>
    %cst_22 = arith.constant dense<0.000000e+00> : vector<2x128xf32>
    %49 = tpu.matmul %47, %48, %cst_22 {dimension_numbers = #tpu.dot_dimension_numbers<[1], [0], [0], [1], [0, 0, 1, 1], [], []>} : vector<2x256xbf16>, vector<256x128xbf16>, vector<2x128xf32> -> vector<2x128xf32>
    %c0_23 = arith.constant 0 : index
    %c0_24 = arith.constant 0 : index
    %50 = vector.load %arg9[%c0_23, %c0_24] : memref<1x128xf32, #tpu.memory_space<vmem>>, vector<1x128xf32>
    %51 = vector.broadcast %50 : vector<1x128xf32> to vector<2x128xf32>
    %52 = arith.addf %49, %51 : vector<2x128xf32>
    %cst_25 = arith.constant 0.000000e+00 : f32
    %53 = vector.broadcast %cst_25 : f32 to vector<2x128xf32>
    %54 = arith.maximumf %52, %53 : vector<2x128xf32>
    %55 = arith.truncf %54 : vector<2x128xf32> to vector<2x128xbf16>
    %c0_26 = arith.constant 0 : index
    %c0_27 = arith.constant 0 : index
    %56 = vector.load %arg10[%c0_26, %c0_27] : memref<128x128xbf16, #tpu.memory_space<vmem>>, vector<128x128xbf16>
    %cst_28 = arith.constant dense<0.000000e+00> : vector<2x128xf32>
    %57 = tpu.matmul %55, %56, %cst_28 {dimension_numbers = #tpu.dot_dimension_numbers<[1], [0], [0], [1], [0, 0, 1, 1], [], []>} : vector<2x128xbf16>, vector<128x128xbf16>, vector<2x128xf32> -> vector<2x128xf32>
    %c0_29 = arith.constant 0 : index
    %c0_30 = arith.constant 0 : index
    %58 = vector.load %arg11[%c0_29, %c0_30] : memref<1x128xf32, #tpu.memory_space<vmem>>, vector<1x128xf32>
    %59 = vector.broadcast %58 : vector<1x128xf32> to vector<2x128xf32>
    %60 = arith.addf %57, %59 : vector<2x128xf32>
    %cst_31 = arith.constant 0.000000e+00 : f32
    %61 = vector.broadcast %cst_31 : f32 to vector<2x128xf32>
    %62 = arith.maximumf %60, %61 : vector<2x128xf32>
    %c0_32 = arith.constant 0 : index
    %c0_33 = arith.constant 0 : index
    %63 = vector.load %arg12[%c0_32, %c0_33] : memref<384x2xf32, #tpu.memory_space<vmem>>, vector<128x2xf32>
    %cst_34 = arith.constant dense<0.000000e+00> : vector<2x2xf32>
    %64 = tpu.matmul %22, %63, %cst_34 {dimension_numbers = #tpu.dot_dimension_numbers<[1], [0], [0], [1], [0, 0, 1, 1], [], []>} : vector<2x128xf32>, vector<128x2xf32>, vector<2x2xf32> -> vector<2x2xf32>
    %c0_35 = arith.constant 0 : index
    %c0_36 = arith.constant 0 : index
    %65 = vector.load %arg4[%c0_35, %c0_36] : memref<2x128xf32, #tpu.memory_space<vmem>>, vector<2x128xf32>
    %c128 = arith.constant 128 : index
    %c0_37 = arith.constant 0 : index
    %66 = vector.load %arg12[%c128, %c0_37] : memref<384x2xf32, #tpu.memory_space<vmem>>, vector<128x2xf32>
    %cst_38 = arith.constant dense<0.000000e+00> : vector<2x2xf32>
    %67 = tpu.matmul %65, %66, %cst_38 {dimension_numbers = #tpu.dot_dimension_numbers<[1], [0], [0], [1], [0, 0, 1, 1], [], []>} : vector<2x128xf32>, vector<128x2xf32>, vector<2x2xf32> -> vector<2x2xf32>
    %68 = arith.addf %64, %67 : vector<2x2xf32>
    %c256 = arith.constant 256 : index
    %c0_39 = arith.constant 0 : index
    %69 = vector.load %arg12[%c256, %c0_39] : memref<384x2xf32, #tpu.memory_space<vmem>>, vector<128x2xf32>
    %cst_40 = arith.constant dense<0.000000e+00> : vector<2x2xf32>
    %70 = tpu.matmul %62, %69, %cst_40 {dimension_numbers = #tpu.dot_dimension_numbers<[1], [0], [0], [1], [0, 0, 1, 1], [], []>} : vector<2x128xf32>, vector<128x2xf32>, vector<2x2xf32> -> vector<2x2xf32>
    %71 = arith.addf %68, %70 : vector<2x2xf32>
    %c0_41 = arith.constant 0 : index
    %c0_42 = arith.constant 0 : index
    %72 = vector.load %arg13[%c0_41, %c0_42] : memref<1x2xf32, #tpu.memory_space<vmem>>, vector<1x2xf32>
    %73 = vector.broadcast %72 : vector<1x2xf32> to vector<2x2xf32>
    %74 = arith.addf %71, %73 : vector<2x2xf32>
    %c0_43 = arith.constant 0 : index
    %c0_44 = arith.constant 0 : index
    %75 = vector.load %arg14[%c0_43, %c0_44] : memref<2x2xf32, #tpu.memory_space<vmem>>, vector<2x2xf32>
    tpu.vector_store %arg14[%c0_43, %c0_44], %74 {strides = array<i32>} : memref<2x2xf32, #tpu.memory_space<vmem>>, vector<2x2xf32>,
    return
  }
}

</mosaic_0001>

<bundles_post_ra>
// kernel: spectro_eda_net_forward.3
= control target key start
LH: loop header
LB: loop body
LE: loop exit
PB: predicated region body
PF: predicated region fallthrough
CT: control target
= control target key end

     0   :  { %s1220_s24 = smov 0   ;;  %s1514_s0 = inlined_call_operand.vmem [shape: bf16[2,256,9], index: 0, kind: input, shape index: {}]   ;;  %s1515_s1 = inlined_call_operand.vmem [shape: bf16[9,64], index: 1, kind: input, shape index: {}]   ;;  %s1516_s2 = inlined_call_operand.vmem [shape: f32[3,64], index: 2, kind: input, shape index: {}]   ;;  %s1517_s3 = inlined_call_operand.vmem [shape: bf16[2,16,3], index: 3, kind: input, shape index: {}]   ;;  %s1518_s4 = inlined_call_operand.vmem [shape: bf16[3,64], index: 4, kind: input, shape index: {}]   ;;  %s1519_s5 = inlined_call_operand.vmem [shape: f32[3,64], index: 5, kind: input, shape index: {}]   ;;  %s1520_s6 = inlined_call_operand.vmem [shape: bf16[2,64,64], index: 6, kind: output, shape index: {0}]   ;;  %s1521_s7 = inlined_call_operand.vmem [shape: bf16[2,8,64], index: 7, kind: output, shape index: {1}]  }
   0x1 LB: > { %s1005_s25 = sadd.s32 4294967295, %s1175_s24   ;;  %p1009_p0 = scmp.ge.s32.totalorder %s1175_s24, 1  ;;  %s1175_s24 = sphi %s1220_s24, %s18_s24  }
   0x2   : > { %p250_p1 = scmp.lt.s32.totalorder %s1175_s24, 3 }
   0x4   : > { %p251_p2 = pnand %p1009_p0, %p250_p1 }
   0x5   : > { %v1151_v0 = vld [vmem:[%s1515_s1] sm:$0x1f] (!%p251_p2)   ;;  %vm484_vm0 = vcmask (!%p251_p2), 1043456   ;;  %vm485_vm1 = vcmask (!%p251_p2), 1044480   ;;  %p291_p3 = scmp.lt.s32.totalorder (!%p251_p2), %s1005_s25, 1  ;;  %v1177_v1 = vmov (!%p251_p2), 65535  }
   0x6   : > { %254 = sbr.rel (%p251_p2) target bundleno = 285 (0x11d), region = 44  ;;  %v486_v2 = vsel (!%p251_p2), %vm484_vm0, 4294967295, %v1177_v1  ;;  %vm840_vm2 = vcmask (!%p251_p2), 1040384   ;;  %vm841_vm3 = vcmask (!%p251_p2), 1041408   ;;  %vm435_vm4 = vcmask (!%p251_p2), 72704  }
   0x7   : > { %v487_v3 = vsel (!%p251_p2), %vm485_vm1, %v486_v2, 0  ;;  %v842_v4 = vsel (!%p251_p2), %vm840_vm2, 4294967295, %v1177_v1  ;;  %v825_v6 = vld [vmem:[%s1518_s4] sm:$0x3] (!%p251_p2)  ;;  %v1178_v10 = vmov (!%p251_p2), 0.0   ;;  %vm1179_vm5 = vmmov (!%p251_p2), 0  }
   0x8   : > { %v489_v5 = vand.u32 (!%p251_p2), %v1151_v0, %v487_v3  ;;  %v843_v7 = vsel (!%p251_p2), %vm841_vm3, %v842_v4, 0  ;;  %vm836_vm6 = vcmask (!%p251_p2), 23552   ;;  %v1281_v27 = vld [vmem:[%s1516_s2] ss:$0 sm:$0xff] (!%p251_p2)  ;;  %v1287_v32 = vld [vmem:[%s1516_s2 + $0x1] ss:$0 sm:$0xff] (!%p251_p2) }
   0x9   : > { %v845_v12 = vand.u32 (!%p251_p2), %v843_v7, %v825_v6  ;;  %v1299_v48 = vld [vmem:[%s1516_s2 + $0x2] ss:$0 sm:$0xff] (!%p251_p2)  ;;  %vm814_vm7 = vcmask (!%p251_p2), 519168  }
   0xa   : > { %1098 = vmatprep.subr.bf16.mxu0 (!%p251_p2), %v489_v5  ;;  %1138 = vmatprep.subr.bf16.mxu1 (!%p251_p2), %v489_v5 }
   0xb   : > { %1099 = vmatpush3.bf16.msra.mxu0 (!%p251_p2), %v489_v5  ;;  %1139 = vmatpush3.bf16.msra.mxu1 (!%p251_p2), %v489_v5 }
   0xc   : > { %1132 = vmatprep.subr.bf16.mxu1 (!%p251_p2), %v1178_v10 }
   0xd   : > { %s1523_s25 = smov (!%p291_p3, %s1005_s25), 1 }
   0xe   : > { %s1068_s28 = sshll.u32 %s1523_s25, 7  ;;  %s1069_s11 = sshll.u32 %s1523_s25, 3 }
   0xf   : > { %s1237_s8 = scalar_lea.vmem %s1514_s0, %s1068_s28  ;;  %s300_s14 = scalar_lea.vmem %s1517_s3, %s1069_s11 }
  0x10   : > { %v1152_v8 = vld [vmem:[%s1237_s8] sm:$0xff]   ;;  %v1153_v9 = vld [vmem:[%s1237_s8 + $0x50] sm:$0xff]   ;;  %v1154_v11 = vld [vmem:[%s1237_s8 + $0x8] sm:$0xff]   ;;  %s1070_s29 = sshll.u32 %s1523_s25, 5  ;;  %s1016_s30 = sshll.u32 %s1523_s25, 2 }
  0x11   : > { %1100 = vmatprep.mubr.msk.bf16.mxu0 %vm435_vm4, %v1152_v8  ;;  %1120 = vmatprep.mubr.msk.bf16.mxu1 %vm435_vm4, %v1153_v9  ;;  %v1155_v13 = vld [vmem:[%s1237_s8 + $0x58] sm:$0xff]   ;;  %v1156_v14 = vld [vmem:[%s1237_s8 + $0x10] sm:$0xff]   ;;  %v1157_v15 = vld [vmem:[%s1237_s8 + $0x60] sm:$0xff]   ;;  %s1461_s10 = scalar_lea.vmem %s1520_s6, %s1070_s29  ;;  %s309_s12 = scalar_lea.vmem %s1521_s7, %s1016_s30 }
  0x12   : > { %1101 = vmatmul.mubr.msk.bf16.vlgmr.msra.gmra.mrb[0].mxu0 %vm435_vm4, %v1154_v11  ;;  %1121 = vmatmul.mubr.msk.bf16.vlgmr.msra.gmra.mrb[0].mxu1 %vm435_vm4, %v1155_v13  ;;  %v1158_v16 = vld [vmem:[%s1237_s8 + $0x18] sm:$0xff]   ;;  %v1159_v17 = vld [vmem:[%s1237_s8 + $0x68] sm:$0xff]   ;;  %v1160_v18 = vld [vmem:[%s1237_s8 + $0x20] sm:$0xff]  }
  0x13   : > { %1104 = vmatprep.mubr.msk.bf16.mxu0 %vm435_vm4, %v1156_v14  ;;  %1133 = vmatpush3.bf16.msra.mxu1 %v845_v12  ;;  %v1161_v19 = vld [vmem:[%s1237_s8 + $0x70] sm:$0xff]   ;;  %v1162_v20 = vld [vmem:[%s1237_s8 + $0x28] sm:$0xff]   ;;  %v1163_v21 = vld [vmem:[%s1237_s8 + $0x78] sm:$0xff]  }
  0x14   : > { %1124 = vmatprep.mubr.msk.bf16.mxu1 %vm435_vm4, %v1157_v15  ;;  %v1164_v22 = vld [vmem:[%s1237_s8 + $0x30] sm:$0xff]   ;;  %v1165_v23 = vld [vmem:[%s1237_s8 + $0x38] sm:$0xff]   ;;  %v1166_v24 = vld [vmem:[%s1237_s8 + $0x40] sm:$0xff]  }
  0x15   : > { %v1168_v25 = vld [vmem:[%s300_s14] sm:$0xff]   ;;  %v1167_v26 = vld [vmem:[%s1237_s8 + $0x48] sm:$0xff]  }
  0x1a   : > { %1105 = vmatmul.mubr.msk.bf16.gmra.mrb[4].mxu0 %vm435_vm4, %v1158_v16  ;;  %1125 = vmatmul.mubr.msk.bf16.gmra.mrb[4].mxu1 %vm435_vm4, %v1159_v17 }
  0x1b   : > { %1108 = vmatprep.mubr.msk.bf16.mxu0 %vm435_vm4, %v1160_v18  ;;  %1128 = vmatprep.mubr.msk.bf16.mxu1 %vm435_vm4, %v1161_v19 }
  0x22   : > { %1109 = vmatmul.mubr.msk.bf16.gmra.mrb[8].mxu0 %vm435_vm4, %v1162_v20  ;;  %1129 = vmatmul.mubr.msk.bf16.gmra.mrb[8].mxu1 %vm435_vm4, %v1163_v21 }
  0x23   : > { %1112 = vmatprep.mubr.msk.bf16.mxu0 %vm435_vm4, %v1164_v22  ;;  %1134 = vmatprep.mubr.msk.bf16.mxu1 %vm1179_vm5, %v1178_v10 }
  0x2a   : > { %1113 = vmatmul.mubr.msk.bf16.gmra.mrb[12].mxu0 %vm435_vm4, %v1165_v23  ;;  %1135 = vmatmul.mubr.msk.bf16.vlgmr.msra.gmra.mrb[12].mxu1 %vm836_vm6, %v1168_v25 }
  0x2b   : > { %1116 = vmatprep.mubr.msk.bf16.mxu0 %vm435_vm4, %v1166_v24 }
  0x32   : > { %1117 = vmatmul.mubr.msk.bf16.gmra.mrb[16].mxu0 %vm435_vm4, %v1167_v26 }
  0xe5   : > { %v1102_v28 = vpop.f32.mrb[0].mxu0  ;;  %v1122_v31 = vpop.f32.mrb[0].mxu1 }
  0xe6   : > { %v534_v29 = vadd.f32 %v1102_v28, %v1281_v27  ;;  %v525_v30 = vpop.f32.mrb[1].mxu0  ;;  %v614_v35 = vadd.f32 %v1122_v31, %v1281_v27  ;;  %v605_v36 = vpop.f32.mrb[1].mxu1 }
  0xe7   : > { %v526_v33 = vadd.f32 %v1281_v27, %v525_v30  ;;  %v1103_v34 = vpop.f32.mrb[2].mxu0  ;;  %v606_v40 = vadd.f32 %v1281_v27, %v605_v36  ;;  %v1123_v41 = vpop.f32.mrb[2].mxu1 }
  0xe8   : > { %v654_v37 = vmax.f32 %v534_v29, 0.0  ;;  %v537_v38 = vadd.f32 %v1103_v34, %v1281_v27  ;;  %v528_v39 = vpop.f32.mrb[3].mxu0  ;;  %v674_v44 = vmax.f32 %v614_v35, 0.0  ;;  %v617_v45 = vadd.f32 %v1123_v41, %v1281_v27  ;;  %v608_v46 = vpop.f32.mrb[3].mxu1 }
  0xe9   : > { %v652_v42 = vmax.f32 %v526_v33, 0.0  ;;  %v529_v43 = vadd.f32 %v1281_v27, %v528_v39  ;;  %v672_v50 = vmax.f32 %v606_v40, 0.0  ;;  %v609_v51 = vadd.f32 %v1281_v27, %v608_v46 }
  0xea   : > { %v691_v47 = vmul.f32 %v1287_v32, %v654_v37  ;;  %v655_v49 = vmax.f32 %v537_v38, 0.0  ;;  %v675_v54 = vmax.f32 %v617_v45, 0.0  ;;  %v711_v58 = vmul.f32 %v1287_v32, %v674_v44 }
  0xeb   : > { %v689_v52 = vmul.f32 %v1287_v32, %v652_v42  ;;  %v653_v53 = vmax.f32 %v529_v43, 0.0  ;;  %v673_v55 = vmax.f32 %v609_v51, 0.0  ;;  %v709_v63 = vmul.f32 %v1287_v32, %v672_v50 }
  0xec   : > { %v1304_v56 = vadd.f32 %v1299_v48, %v691_v47  ;;  %v692_v60 = vmul.f32 %v1287_v32, %v655_v49  ;;  %v712_v4 = vmul.f32 %v1287_v32, %v675_v54  ;;  %v1327_v22 = vadd.f32 %v1299_v48, %v711_v58 }
  0xed   : > { %v1106_v57 = vpop.f32.mrb[4].mxu0  ;;  %v1308_v59 = vadd.f32 %v1299_v48, %v689_v52  ;;  %v1126_v0 = vpop.f32.mrb[4].mxu1  ;;  %v690_v1 = vmul.f32 %v1287_v32, %v653_v53  ;;  %v710_v10 = vmul.f32 %v1287_v32, %v673_v55  ;;  %v1338_v29 = vadd.f32 %v1299_v48, %v709_v63 }
  0xee   : > { %v550_v61 = vadd.f32 %v1106_v57, %v1281_v27  ;;  %v541_v62 = vpop.f32.mrb[5].mxu0  ;;  %v630_v5 = vadd.f32 %v1126_v0, %v1281_v27  ;;  %v621_v6 = vpop.f32.mrb[5].mxu1  ;;  %v1332_v26 = vadd.f32 %v1299_v48, %v692_v60  ;;  %v1347_v34 = vadd.f32 %v1299_v48, %v712_v4 }
  0xef   : > { %v542_v2 = vadd.f32 %v1281_v27, %v541_v62  ;;  %v1107_v3 = vpop.f32.mrb[6].mxu0  ;;  %v622_v11 = vadd.f32 %v1281_v27, %v621_v6  ;;  %v1127_v12 = vpop.f32.mrb[6].mxu1  ;;  %v1335_v28 = vadd.f32 %v1299_v48, %v690_v1  ;;  %v1350_v35 = vadd.f32 %v1299_v48, %v710_v10 }
  0xf0   : > { %v658_v7 = vmax.f32 %v550_v61, 0.0  ;;  %v553_v8 = vadd.f32 %v1107_v3, %v1281_v27  ;;  %v544_v9 = vpop.f32.mrb[7].mxu0  ;;  %v678_v15 = vmax.f32 %v630_v5, 0.0  ;;  %v633_v16 = vadd.f32 %v1127_v12, %v1281_v27  ;;  %v624_v17 = vpop.f32.mrb[7].mxu1 }
  0xf1   : > { %v656_v13 = vmax.f32 %v542_v2, 0.0  ;;  %v545_v14 = vadd.f32 %v1281_v27, %v544_v9  ;;  %v676_v20 = vmax.f32 %v622_v11, 0.0  ;;  %v1324_v21 = vadd.f32 %v1281_v27, %v624_v17 }
  0xf2   : > { %v695_v18 = vmul.f32 %v1287_v32, %v658_v7  ;;  %v659_v19 = vmax.f32 %v553_v8, 0.0  ;;  %v715_v25 = vmul.f32 %v1287_v32, %v678_v15  ;;  %v679_v30 = vmax.f32 %v633_v16, 0.0 }
  0xf3   : > { %v693_v23 = vmul.f32 %v1287_v32, %v656_v13  ;;  %v657_v24 = vmax.f32 %v545_v14, 0.0  ;;  %v1356_v38 = vmul.f32 %v1287_v32, %v676_v20  ;;  %v677_v39 = vmax.f32 %v1324_v21, 0.0 }
  0xf4   : > { %v1341_v31 = vadd.f32 %v1299_v48, %v695_v18  ;;  %v1344_v33 = vmul.f32 %v1287_v32, %v659_v19  ;;  %v1364_v44 = vadd.f32 %v1299_v48, %v715_v25  ;;  %v1369_v50 = vmul.f32 %v1287_v32, %v679_v30 }
  0xf5   : > { %v1110_v36 = vpop.f32.mrb[8].mxu0  ;;  %v1353_v37 = vadd.f32 %v1299_v48, %v693_v23  ;;  %v1130_v41 = vpop.f32.mrb[8].mxu1  ;;  %v1361_v43 = vmul.f32 %v1287_v32, %v657_v24 }
  0xf6   : > { %v566_v40 = vadd.f32 %v1110_v36, %v1281_v27  ;;  %v557_v42 = vpop.f32.mrb[9].mxu0  ;;  %v646_v45 = vadd.f32 %v1130_v41, %v1281_v27  ;;  %v637_v47 = vpop.f32.mrb[9].mxu1  ;;  %v1061_v41 = vld [vmem:[%s1519_s5] ss:$0 sm:$0xff] }
  0xf7   : > { %v558_v46 = vadd.f32 %v1281_v27, %v557_v42  ;;  %v1111_v49 = vpop.f32.mrb[10].mxu0  ;;  %v638_v52 = vadd.f32 %v1281_v27, %v637_v47  ;;  %v1131_v54 = vpop.f32.mrb[10].mxu1 }
  0xf8   : > { %v662_v51 = vmax.f32 %v566_v40, 0.0  ;;  %v569_v53 = vadd.f32 %v1111_v49, %v1281_v27  ;;  %v560_v55 = vpop.f32.mrb[11].mxu0  ;;  %v682_v57 = vmax.f32 %v646_v45, 0.0  ;;  %v649_v60 = vadd.f32 %v1131_v54, %v1281_v27  ;;  %v640_v62 = vpop.f32.mrb[11].mxu1 }
  0xf9   : > { %v660_v58 = vmax.f32 %v558_v46, 0.0  ;;  %v561_v61 = vadd.f32 %v1281_v27, %v560_v55  ;;  %v680_v0 = vmax.f32 %v638_v52, 0.0  ;;  %v641_v2 = vadd.f32 %v1281_v27, %v640_v62 }
  0xfa   : > { %v699_v63 = vmul.f32 %v1287_v32, %v662_v51  ;;  %v663_v1 = vmax.f32 %v569_v53, 0.0  ;;  %v719_v3 = vmul.f32 %v1287_v32, %v682_v57  ;;  %v683_v5 = vmax.f32 %v649_v60, 0.0 }
  0xfb   : > { %v697_v4 = vmul.f32 %v1287_v32, %v660_v58  ;;  %v661_v6 = vmax.f32 %v561_v61, 0.0  ;;  %v717_v8 = vmul.f32 %v1287_v32, %v680_v0  ;;  %v681_v10 = vmax.f32 %v641_v2, 0.0  ;;  %v1064_v0 = vld [vmem:[%s1519_s5 + $0x1] ss:$0 sm:$0xff] }
  0xfc   : > { %v1380_v7 = vadd.f32 %v1299_v48, %v699_v63  ;;  %v700_v9 = vmul.f32 %v1287_v32, %v663_v1  ;;  %v1385_v11 = vadd.f32 %v1299_v48, %v719_v3  ;;  %v720_v13 = vmul.f32 %v1287_v32, %v683_v5 }
  0xfd   : > { %v1388_v12 = vadd.f32 %v1299_v48, %v697_v4  ;;  %v698_v14 = vmul.f32 %v1287_v32, %v661_v6  ;;  %v1114_v15 = vpop.f32.mrb[12].mxu0  ;;  %v1395_v17 = vadd.f32 %v1299_v48, %v717_v8  ;;  %v718_v19 = vmul.f32 %v1287_v32, %v681_v10  ;;  %v881_v23 = vpop.f32.mrb[12].mxu1 }
  0xfe   : > { %v760_v16 = vmax.f32 %v1304_v56, %v1380_v7  ;;  %v1398_v18 = vadd.f32 %v1299_v48, %v700_v9  ;;  %v573_v20 = vpop.f32.mrb[13].mxu0  ;;  %v772_v24 = vmax.f32 %v1327_v22, %v1385_v11  ;;  %v1406_v30 = vadd.f32 %v1299_v48, %v720_v13  ;;  %v1136_v42 = vpop.f32.mrb[13].mxu1  ;;  %v1065_v9 = vld [vmem:[%s1519_s5 + $0x2] ss:$0 sm:$0xff] }
  0xff   : > { %v758_v25 = vmax.f32 %v1308_v59, %v1388_v12  ;;  %v1409_v36 = vadd.f32 %v1299_v48, %v698_v14  ;;  %v1115_v40 = vpop.f32.mrb[14].mxu0  ;;  %v770_v45 = vmax.f32 %v1338_v29, %v1395_v17  ;;  %v755_v46 = vadd.f32 %v1299_v48, %v718_v19  ;;  %v884_v51 = vpop.f32.mrb[14].mxu1 }
 0x100   : > { %v761_v22 = vmax.f32 %v1332_v26, %v1398_v18  ;;  %v582_v47 = vadd.f32 %v1114_v15, %v1281_v27  ;;  %v576_v49 = vpop.f32.mrb[15].mxu0  ;;  %v773_v52 = vmax.f32 %v1347_v34, %v1406_v30  ;;  %v574_v54 = vadd.f32 %v1281_v27, %v573_v20  ;;  %v1137_v29 = vpop.f32.mrb[15].mxu1 }
 0x101   : > { %v759_v53 = vmax.f32 %v1335_v28, %v1409_v36  ;;  %v585_v55 = vadd.f32 %v1115_v40, %v1281_v27  ;;  %v771_v57 = vmax.f32 %v1350_v35, %v755_v46  ;;  %v577_v60 = vadd.f32 %v1281_v27, %v576_v49 }
 0x102   : > { %v666_v58 = vmax.f32 %v582_v47, 0.0  ;;  %v882_v61 = vadd.f32 %v1061_v41, %v881_v23  ;;  %v733_v62 = vadd.f32 %v1299_v48, %v1344_v33  ;;  %v664_v63 = vmax.f32 %v574_v54, 0.0 }
 0x103   : > { %v667_v34 = vmax.f32 %v585_v55, 0.0  ;;  %v885_v1 = vadd.f32 %v1061_v41, %v884_v51  ;;  %v1435_v2 = vadd.f32 %v1299_v48, %v1356_v38  ;;  %v665_v3 = vmax.f32 %v577_v60, 0.0 }
 0x104   : > { %v703_v35 = vmul.f32 %v1287_v32, %v666_v58  ;;  %v888_v4 = vmax.f32 %v882_v61, 0.0  ;;  %v731_v5 = vadd.f32 %v1299_v48, %v1361_v43  ;;  %v701_v33 = vmul.f32 %v1287_v32, %v664_v63 }
 0x105   : > { %v704_v6 = vmul.f32 %v1287_v32, %v667_v34  ;;  %v1118_v8 = vpop.f32.mrb[16].mxu0  ;;  %v889_v10 = vmax.f32 %v885_v1, 0.0  ;;  %v702_v11 = vmul.f32 %v1287_v32, %v665_v3 }
 0x106   : > { %v740_v38 = vadd.f32 %v1299_v48, %v703_v35  ;;  %v598_v13 = vadd.f32 %v1118_v8, %v1281_v27  ;;  %v895_v14 = vmul.f32 %v1064_v0, %v888_v4  ;;  %v589_v15 = vpop.f32.mrb[17].mxu0  ;;  %v738_v43 = vadd.f32 %v1299_v48, %v701_v33 }
 0x107   : > { %v741_v17 = vadd.f32 %v1299_v48, %v704_v6  ;;  %v590_v19 = vadd.f32 %v1281_v27, %v589_v15  ;;  %v1119_v20 = vpop.f32.mrb[18].mxu0  ;;  %v896_v23 = vmul.f32 %v1064_v0, %v889_v10  ;;  %v739_v40 = vadd.f32 %v1299_v48, %v702_v11 }
 0x108   : > { %v764_v30 = vmax.f32 %v1341_v31, %v740_v38  ;;  %v670_v41 = vmax.f32 %v598_v13, 0.0  ;;  %v902_v42 = vadd.f32 %v1065_v9, %v895_v14  ;;  %v592_v46 = vpop.f32.mrb[19].mxu0  ;;  %v762_v47 = vmax.f32 %v1353_v37, %v738_v43 }
 0x109   : > { %v765_v49 = vmax.f32 %v733_v62, %v741_v17  ;;  %v668_v51 = vmax.f32 %v590_v19, 0.0  ;;  %v601_v54 = vadd.f32 %v1119_v20, %v1281_v27  ;;  %v763_v29 = vmax.f32 %v731_v5, %v739_v40 }
 0x10a   : > { %v780_v55 = vmax.f32 %v764_v30, %v772_v24  ;;  %v707_v58 = vmul.f32 %v1287_v32, %v670_v41  ;;  %v903_v60 = vadd.f32 %v1065_v9, %v896_v23  ;;  %v778_v31 = vmax.f32 %v762_v47, %v770_v45 }
 0x10b   : > { %v781_v61 = vmax.f32 %v765_v49, %v773_v52  ;;  %v705_v37 = vmul.f32 %v1287_v32, %v668_v51  ;;  %v671_v62 = vmax.f32 %v601_v54, 0.0  ;;  %v779_v24 = vmax.f32 %v763_v29, %v771_v57 }
 0x10c   : > { %v1077_v63 = vpack.c.bf16 %v780_v55, %v780_v55  ;;  %v744_v34 = vadd.f32 %v1299_v48, %v707_v58  ;;  %v904_v0 = vmax.f32 %v902_v42, %v903_v60  ;;  %v1075_v1 = vpack.c.bf16 %v778_v31, %v778_v31 }
 0x10d   : > { %v1078_v35 = vpack.c.bf16 %v781_v61, %v781_v61  ;;  %v742_v3 = vadd.f32 %v1299_v48, %v705_v37  ;;  %v708_v4 = vmul.f32 %v1287_v32, %v671_v62  ;;  %v1076_v45 = vpack.c.bf16 %v779_v24, %v779_v24 }
 0x10e   : > { %821 = vst.msk [vmem:[%s1461_s10 + $0x18] sm:$0xf] %vm814_vm7, %v1077_v63  ;;  %v768_v52 = vmax.f32 %v744_v34, %v1364_v44  ;;  %v905_v57 = vpack.c.bf16 %v904_v0, %v904_v0  ;;  %v593_v5 = vadd.f32 %v1281_v27, %v592_v46  ;;  %v753_v33 = vadd.f32 %v1299_v48, %v1369_v50 }
 0x10f   : > { %819 = vst.msk [vmem:[%s1461_s10 + $0x10] sm:$0xf] %vm814_vm7, %v1075_v1  ;;  %822 = vst.msk [vmem:[%s1461_s10 + $0x1c] sm:$0xf] %vm814_vm7, %v1078_v35  ;;  %v766_v6 = vmax.f32 %v742_v3, %v1435_v2  ;;  %v745_v8 = vadd.f32 %v1299_v48, %v708_v4  ;;  %v714_v44 = vmul.f32 %v1287_v32, %v677_v39 }
 0x110   : > { %820 = vst.msk [vmem:[%s1461_s10 + $0x14] sm:$0xf] %vm814_vm7, %v1076_v45  ;;  %v776_v27 = vmax.f32 %v760_v16, %v768_v52  ;;  %906 = vst.msk [vmem:[%s309_s12] sm:$0xf] %vm814_vm7, %v905_v57  ;;  %v669_v50 = vmax.f32 %v593_v5, 0.0 }
 0x111   : > { %v774_v2 = vmax.f32 %v758_v25, %v766_v6  ;;  %v769_v9 = vmax.f32 %v745_v8, %v753_v33  ;;  %v751_v56 = vadd.f32 %v1299_v48, %v714_v44 }
 0x112   : > { %v1073_v10 = vpack.c.bf16 %v776_v27, %v776_v27  ;;  %v706_v21 = vmul.f32 %v1287_v32, %v669_v50 }
 0x113   : > { %v1071_v39 = vpack.c.bf16 %v774_v2, %v774_v2  ;;  %v777_v38 = vmax.f32 %v761_v22, %v769_v9 }
 0x114   : > { %817 = vst.msk [vmem:[%s1461_s10 + $0x8] sm:$0xf] %vm814_vm7, %v1073_v10  ;;  %v743_v7 = vadd.f32 %v1299_v48, %v706_v21 }
 0x115   : > { %815 = vst.msk [vmem:[%s1461_s10] sm:$0xf] %vm814_vm7, %v1071_v39  ;;  %v1074_v59 = vpack.c.bf16 %v777_v38, %v777_v38 }
 0x116   : > { %v767_v12 = vmax.f32 %v743_v7, %v751_v56 }
 0x117   : > { %818 = vst.msk [vmem:[%s1461_s10 + $0xc] sm:$0xf] %vm814_vm7, %v1074_v59 }
 0x118   : > { %v775_v32 = vmax.f32 %v759_v53, %v767_v12 }
 0x11a   : > { %v1072_v16 = vpack.c.bf16 %v775_v32, %v775_v32 }
 0x11c   : > { %816 = vst.msk [vmem:[%s1461_s10 + $0x4] sm:$0xf] %vm814_vm7, %v1072_v16 }
 0x11d PF: > { %s18_s24 = sadd.s32 1, %s1175_s24  }
 0x11e   : > { %p15_p4 = scmp.ge.s32.totalorder %s18_s24, 4  }
 0x120   :  { %17 = sbr.rel (!%p15_p4) target bundleno = 1 (0x1), region = 89 }

// kernel: spectro_eda_net_forward.4
= control target key start
LH: loop header
LB: loop body
LE: loop exit
PB: predicated region body
PF: predicated region fallthrough
CT: control target
= control target key end

     0   :  { %s1599_s24 = smov 0   ;;  %s1836_s0 = inlined_call_operand.vmem [shape: bf16[2,64,576], index: 0, kind: input, shape index: {}]   ;;  %s1837_s1 = inlined_call_operand.vmem [shape: bf16[576,128], index: 1, kind: input, shape index: {}]   ;;  %s1838_s2 = inlined_call_operand.vmem [shape: f32[3,128], index: 2, kind: input, shape index: {}]   ;;  %s1839_s3 = inlined_call_operand.vmem [shape: bf16[2,8,192], index: 3, kind: input, shape index: {}]   ;;  %s1840_s4 = inlined_call_operand.vmem [shape: bf16[192,128], index: 4, kind: input, shape index: {}]   ;;  %s1841_s5 = inlined_call_operand.vmem [shape: f32[3,128], index: 5, kind: input, shape index: {}]   ;;  %s1842_s6 = inlined_call_operand.vmem [shape: bf16[2,16,128], index: 6, kind: output, shape index: {0}]   ;;  %s1843_s7 = inlined_call_operand.vmem [shape: f32[2,1,128], index: 7, kind: output, shape index: {1}]  }
   0x1 LB: > { %s1254_s25 = sadd.s32 4294967295, %s1556_s24   ;;  %p1258_p0 = scmp.ge.s32.totalorder %s1556_s24, 1  ;;  %s1556_s24 = sphi %s1599_s24, %s18_s24  }
   0x2   : > { %p250_p1 = scmp.lt.s32.totalorder %s1556_s24, 3 }
   0x4   : > { %p251_p2 = pnand %p1258_p0, %p250_p1 }
   0x5   : > { %v1472_v0 = vld [vmem:[%s1837_s1 + $0x40] sm:$0xff] (!%p251_p2)   ;;  %v1476_v4 = vld [vmem:[%s1837_s1 + $0x48] sm:$0xff] (!%p251_p2)   ;;  %v1480_v8 = vld [vmem:[%s1837_s1 + $0x50] sm:$0xff] (!%p251_p2)   ;;  %p290_p3 = scmp.lt.s32.totalorder (!%p251_p2), %s1254_s25, 1  ;;  %v1558_v36 = vmov (!%p251_p2), 0   ;;  %vm726_vm0 = vcmask (!%p251_p2), 523264  }
   0x6   : > { %254 = sbr.rel (%p251_p2) target bundleno = 328 (0x148), region = 44  ;;  %v1473_v1 = vld [vmem:[%s1837_s1 + $0xc0] sm:$0xff] (!%p251_p2)   ;;  %1358 = vmatprep.subr.bf16.mxu0 (!%p251_p2), %v1472_v0  ;;  %v1477_v5 = vld [vmem:[%s1837_s1 + $0xc8] sm:$0xff] (!%p251_p2)   ;;  %v1481_v9 = vld [vmem:[%s1837_s1 + $0xd0] sm:$0xff] (!%p251_p2)   ;;  %vm1152_vm1 = vcmask (!%p251_p2), 1043456  }
   0x7   : > { %v1474_v2 = vld [vmem:[%s1837_s1] sm:$0xff] (!%p251_p2)   ;;  %1398 = vmatprep.subr.bf16.mxu1 (!%p251_p2), %v1473_v1  ;;  %v1478_v6 = vld [vmem:[%s1837_s1 + $0x8] sm:$0xff] (!%p251_p2)   ;;  %v1482_v10 = vld [vmem:[%s1837_s1 + $0x10] sm:$0xff] (!%p251_p2)  }
   0x8   : > { %v1475_v3 = vld [vmem:[%s1837_s1 + $0x80] sm:$0xff] (!%p251_p2)   ;;  %1359 = vmatpush3.bf16.msra.mxu0 (!%p251_p2), %v1474_v2  ;;  %v1479_v7 = vld [vmem:[%s1837_s1 + $0x88] sm:$0xff] (!%p251_p2)   ;;  %v1483_v11 = vld [vmem:[%s1837_s1 + $0x90] sm:$0xff] (!%p251_p2)  }
   0x9   : > { %1399 = vmatpush3.bf16.msra.mxu1 (!%p251_p2), %v1475_v3  ;;  %1360 = vmatprep.subr.bf16.mxu0 (!%p251_p2), %v1476_v4  ;;  %v1484_v12 = vld [vmem:[%s1837_s1 + $0x58] sm:$0xff] (!%p251_p2)   ;;  %v1488_v16 = vld [vmem:[%s1837_s1 + $0x60] sm:$0xff] (!%p251_p2)   ;;  %v1492_v20 = vld [vmem:[%s1837_s1 + $0x68] sm:$0xff] (!%p251_p2)  }
   0xa   : > { %1400 = vmatprep.subr.bf16.mxu1 (!%p251_p2), %v1477_v5  ;;  %v1485_v13 = vld [vmem:[%s1837_s1 + $0xd8] sm:$0xff] (!%p251_p2)   ;;  %v1489_v17 = vld [vmem:[%s1837_s1 + $0xe0] sm:$0xff] (!%p251_p2)   ;;  %v1493_v21 = vld [vmem:[%s1837_s1 + $0xe8] sm:$0xff] (!%p251_p2)  }
   0xb   : > { %v1486_v14 = vld [vmem:[%s1837_s1 + $0x18] sm:$0xff] (!%p251_p2)   ;;  %v1490_v18 = vld [vmem:[%s1837_s1 + $0x20] sm:$0xff] (!%p251_p2)   ;;  %v1494_v22 = vld [vmem:[%s1837_s1 + $0x28] sm:$0xff] (!%p251_p2)  }
   0xc   : > { %1361 = vmatpush3.bf16.msra.mxu0 (!%p251_p2), %v1478_v6  ;;  %v1487_v15 = vld [vmem:[%s1837_s1 + $0x98] sm:$0xff] (!%p251_p2)   ;;  %v1491_v19 = vld [vmem:[%s1837_s1 + $0xa0] sm:$0xff] (!%p251_p2)   ;;  %v1495_v23 = vld [vmem:[%s1837_s1 + $0xa8] sm:$0xff] (!%p251_p2)  }
   0xd   : > { %1401 = vmatpush3.bf16.msra.mxu1 %v1479_v7  ;;  %1362 = vmatprep.subr.bf16.mxu0 %v1480_v8  ;;  %s1845_s25 = smov (!%p290_p3, %s1254_s25), 1  ;;  %v1496_v24 = vld [vmem:[%s1837_s1 + $0x70] sm:$0xff]   ;;  %v1500_v28 = vld [vmem:[%s1837_s1 + $0x78] sm:$0xff]   ;;  %v1510_v37 = vld [vmem:[%s1840_s4] sm:$0xff]  }
   0xe   : > { %1402 = vmatprep.subr.bf16.mxu1 %v1481_v9  ;;  %v1497_v25 = vld [vmem:[%s1837_s1 + $0xf0] sm:$0xff]   ;;  %s1462_s13 = smul.u32 160, %s1845_s25  ;;  %v1501_v29 = vld [vmem:[%s1837_s1 + $0xf8] sm:$0xff]   ;;  %v1511_v39 = vld [vmem:[%s1840_s4 + $0x8] sm:$0xff]   ;;  %s1349_s8 = sshll.u32 %s1845_s25, 3 }
   0xf   : > { %v1498_v26 = vld [vmem:[%s1837_s1 + $0x30] sm:$0xff]   ;;  %v1502_v30 = vld [vmem:[%s1837_s1 + $0x38] sm:$0xff]   ;;  %v1520_v43 = vld [vmem:[%s1837_s1 + $0x100] sm:$0xff]   ;;  %s304_s18 = scalar_lea.vmem %s1842_s6, %s1349_s8  ;;  %s307_s21 = scalar_lea.vmem %s1843_s7, %s1845_s25 }
  0x10   : > { %1363 = vmatpush3.bf16.msra.mxu0 %v1482_v10  ;;  %v1499_v27 = vld [vmem:[%s1837_s1 + $0xb0] sm:$0xff]   ;;  %s1707_s26 = scalar_lea.vmem %s1836_s0, %s1462_s13  ;;  %v1503_v31 = vld [vmem:[%s1837_s1 + $0xb8] sm:$0xff]   ;;  %v1525_v46 = vld [vmem:[%s1837_s1 + $0x108] sm:$0xff]   ;;  %s299_s13 = scalar_lea.vmem %s1839_s3, %s1349_s8 }
  0x11   : > { %1403 = vmatpush3.bf16.msra.mxu1 %v1483_v11  ;;  %1364 = vmatprep.subr.bf16.mxu0 %v1484_v12  ;;  %v1504_v32 = vld [vmem:[%s1707_s26] ss:$20 sps:$4 sm:$0xff]   ;;  %v1506_v33 = vld [vmem:[%s1707_s26 + $0x4] ss:$20 sps:$4 sm:$0xff]   ;;  %v1507_v34 = vld [vmem:[%s1707_s26 + $0x8] ss:$20 sps:$4 sm:$0xff]  }
  0x12   : > { %1404 = vmatprep.subr.bf16.mxu1 %v1485_v13  ;;  %v1509_v35 = vld [vmem:[%s1707_s26 + $0xc] ss:$20 sps:$4 sm:$0xff]   ;;  %771 = vmatprep.mubr.bf16.mxu0 %v1506_v33  ;;  %v1514_v40 = vld [vmem:[%s1707_s26 + $0x28] ss:$20 sps:$4 sm:$0xff]   ;;  %v1515_v41 = vld [vmem:[%s1840_s4 + $0x10] sm:$0xff]  }
  0x13   : > { %836 = vmatprep.mubr.bf16.mxu1 %v1509_v35  ;;  %v1512_v38 = vld [vmem:[%s1707_s26 + $0x2c] ss:$20 sps:$4 sm:$0xff]   ;;  %v1517_v42 = vld [vmem:[%s1707_s26 + $0x54] ss:$20 sps:$4 sm:$0xff]   ;;  %v1524_v45 = vld [vmem:[%s1707_s26 + $0x30] ss:$20 sps:$4 sm:$0xff]  }
  0x14   : > { %1365 = vmatpush3.bf16.msra.mxu0 %v1486_v14  ;;  %v1522_v44 = vld [vmem:[%s1707_s26 + $0x34] ss:$20 sps:$4 sm:$0xff]   ;;  %v1516_v47 = vld [vmem:[%s1840_s4 + $0x18] sm:$0xff]   ;;  %v1519_v48 = vld [vmem:[%s1707_s26 + $0x50] ss:$20 sps:$4 sm:$0xff]  }
  0x15   : > { %1405 = vmatpush3.bf16.msra.mxu1 %v1487_v15  ;;  %1366 = vmatprep.subr.bf16.mxu0 %v1488_v16  ;;  %v1521_v49 = vld [vmem:[%s1840_s4 + $0x20] sm:$0xff]   ;;  %v1530_v50 = vld [vmem:[%s1837_s1 + $0x110] sm:$0xff]   ;;  %v1534_v53 = vld [vmem:[%s1707_s26 + $0x58] ss:$20 sps:$4 sm:$0xff]  }
  0x16   : > { %1406 = vmatprep.subr.bf16.mxu1 %v1489_v17  ;;  %v1527_v51 = vld [vmem:[%s1707_s26 + $0x7c] ss:$20 sps:$4 sm:$0xff]   ;;  %v1526_v55 = vld [vmem:[%s1840_s4 + $0x28] sm:$0xff]   ;;  %v1540_v58 = vld [vmem:[%s1707_s26 + $0x84] ss:$20 sps:$4 sm:$0xff]  }
  0x17   : > { %v1532_v52 = vld [vmem:[%s1707_s26 + $0x5c] ss:$20 sps:$4 sm:$0xff]   ;;  %v1529_v56 = vld [vmem:[%s1707_s26 + $0x78] ss:$20 sps:$4 sm:$0xff]   ;;  %v1542_v60 = vld [vmem:[%s1707_s26 + $0x80] ss:$20 sps:$4 sm:$0xff]  }
  0x18   : > { %1367 = vmatpush3.bf16.msra.mxu0 %v1490_v18  ;;  %v1535_v54 = vld [vmem:[%s1837_s1 + $0x118] sm:$0xff]   ;;  %v1537_v57 = vld [vmem:[%s1707_s26 + $0x10] ss:$20 sps:$4 sm:$0xff]   ;;  %v1544_v1 = vld [vmem:[%s1707_s26 + $0x60] ss:$20 sps:$4 sm:$0xff]  }
  0x19   : > { %1407 = vmatpush3.bf16.msra.mxu1 %v1491_v19  ;;  %1368 = vmatprep.subr.bf16.mxu0 %v1492_v20  ;;  %v1531_v59 = vld [vmem:[%s1840_s4 + $0x30] sm:$0xff]   ;;  %v1536_v61 = vld [vmem:[%s1840_s4 + $0x38] sm:$0xff]   ;;  %v984_v62 = vld [vmem:[%s299_s13] sm:$0xff] }
  0x1a   : > { %1408 = vmatprep.subr.bf16.mxu1 %v1493_v21  ;;  %v1331_v63 = vcombine.high %v984_v62, %v984_v62  ;;  %v1538_v0 = vld [vmem:[%s1707_s26 + $0x38] ss:$20 sps:$4 sm:$0xff]   ;;  %v1539_v2 = vld [vmem:[%s1840_s4 + $0x40] sm:$0xff]   ;;  %v1545_v4 = vld [vmem:[%s1707_s26 + $0x88] ss:$20 sps:$4 sm:$0xff]   ;;  %v1330_v7 = vcombine.low %v984_v62, %v984_v62 }
  0x1b   : > { %v1543_v3 = vld [vmem:[%s1840_s4 + $0x48] sm:$0xff]   ;;  %v1546_v5 = vld [vmem:[%s1840_s4 + $0x50] sm:$0xff]   ;;  %v1547_v6 = vld [vmem:[%s1840_s4 + $0x58] sm:$0xff]  }
  0x1c   : > { %1369 = vmatpush3.bf16.msra.mxu0 %v1494_v22  ;;  %v1264_v10 = vld [vmem:[%s1838_s2] ss:$0 sm:$0xff] }
  0x1d   : > { %1409 = vmatpush3.bf16.msra.mxu1 %v1495_v23  ;;  %1370 = vmatprep.subr.bf16.mxu0 %v1496_v24 }
  0x1e   : > { %1410 = vmatprep.subr.bf16.mxu1 %v1497_v25 }
  0x20   : > { %1371 = vmatpush3.bf16.msra.mxu0 %v1498_v26 }
  0x21   : > { %1411 = vmatpush3.bf16.msra.mxu1 %v1499_v27  ;;  %1372 = vmatprep.subr.bf16.mxu0 %v1500_v28 }
  0x22   : > { %1412 = vmatprep.subr.bf16.mxu1 %v1501_v29 }
  0x24   : > { %1373 = vmatpush3.bf16.msra.mxu0 %v1502_v30 }
  0x25   : > { %1413 = vmatpush3.bf16.msra.mxu1 %v1503_v31  ;;  %1446 = vmatprep.subr.bf16.mxu0 %v1520_v43 }
  0x26   : > { %1095 = vmatprep.subr.bf16.mxu1 %v1558_v36 }
  0x27   : > { %772 = vmatmul.mubr.bf16.vlgmr.msra.gmra.mrb[0].mxu0 %v1504_v32 }
  0x28   : > { %837 = vmatmul.mubr.bf16.vlgmr.msra.gmra.mrb[0].mxu1 %v1507_v34  ;;  %779 = vmatprep.mubr.bf16.mxu0 %v1512_v38 }
  0x29   : > { %1096 = vmatpush1.bf16.msra.mxu1 %v1510_v37  ;;  %1447 = vmatpush3.bf16.msra.mxu0 %v1520_v43 }
  0x2a   : > { %1097 = vmatprep.subr.bf16.mxu1 %v1558_v36  ;;  %844 = vmatprep.mubr.bf16.mxu1 %v1522_v44 }
  0x2b   : > { %1448 = vmatprep.subr.bf16.mxu0 %v1525_v46 }
  0x2d   : > { %1098 = vmatpush1.bf16.msra.mxu1 %v1511_v39  ;;  %1449 = vmatpush3.bf16.msra.mxu0 %v1525_v46 }
  0x2e   : > { %1099 = vmatprep.subr.bf16.mxu1 %v1558_v36  ;;  %1450 = vmatprep.subr.bf16.mxu0 %v1530_v50 }
  0x2f   : > { %780 = vmatmul.mubr.bf16.gmra.mrb[4].mxu0 %v1514_v40 }
  0x30   : > { %787 = vmatprep.mubr.bf16.mxu0 %v1517_v42  ;;  %845 = vmatmul.mubr.bf16.gmra.mrb[4].mxu1 %v1524_v45 }
  0x31   : > { %1100 = vmatpush1.bf16.msra.mxu1 %v1515_v41  ;;  %852 = vmatprep.mubr.bf16.mxu1 %v1532_v52 }
  0x32   : > { %1101 = vmatprep.subr.bf16.mxu1 %v1558_v36  ;;  %1451 = vmatpush3.bf16.msra.mxu0 %v1530_v50 }
  0x33   : > { %1452 = vmatprep.subr.bf16.mxu0 %v1535_v54 }
  0x35   : > { %1102 = vmatpush1.bf16.msra.mxu1 %v1516_v47 }
  0x36   : > { %1103 = vmatprep.subr.bf16.mxu1 %v1558_v36  ;;  %1453 = vmatpush3.bf16.msra.mxu0 %v1535_v54 }
  0x37   : > { %788 = vmatmul.mubr.bf16.gmra.mrb[8].mxu0 %v1519_v48 }
  0x38   : > { %795 = vmatprep.mubr.bf16.mxu0 %v1527_v51  ;;  %853 = vmatmul.mubr.bf16.gmra.mrb[8].mxu1 %v1534_v53 }
  0x39   : > { %1104 = vmatpush1.bf16.msra.mxu1 %v1521_v49  ;;  %860 = vmatprep.mubr.bf16.mxu1 %v1540_v58 }
  0x3a   : > { %1105 = vmatprep.subr.bf16.mxu1 %v1558_v36 }
  0x3d   : > { %1106 = vmatpush1.bf16.msra.mxu1 %v1526_v55 }
  0x3e   : > { %1107 = vmatprep.subr.bf16.mxu1 %v1558_v36 }
  0x3f   : > { %796 = vmatmul.mubr.bf16.gmra.mrb[12].mxu0 %v1529_v56 }
  0x40   : > { %1454 = vmatprep.mubr.msk.bf16.mxu0 %vm726_vm0, %v1537_v57  ;;  %861 = vmatmul.mubr.bf16.gmra.mrb[12].mxu1 %v1542_v60 }
  0x41   : > { %1108 = vmatpush1.bf16.msra.mxu1 %v1531_v59  ;;  %1344 = vmatprep.mubr.msk.bf16.mxu1 %vm726_vm0, %v1331_v63 }
  0x42   : > { %1109 = vmatprep.subr.bf16.mxu1 %v1558_v36 }
  0x45   : > { %1110 = vmatpush1.bf16.msra.mxu1 %v1536_v61 }
  0x46   : > { %1111 = vmatprep.subr.bf16.mxu1 %v1558_v36 }
  0x47   : > { %1455 = vmatmul.mubr.msk.bf16.vlgmr.msra.gmra.mrb[16].mxu0 %vm726_vm0, %v1538_v0 }
  0x48   : > { %1458 = vmatprep.mubr.msk.bf16.mxu0 %vm726_vm0, %v1544_v1 }
  0x49   : > { %1112 = vmatpush1.bf16.msra.mxu1 %v1539_v2 }
  0x4a   : > { %1113 = vmatprep.subr.bf16.mxu1 %v1558_v36 }
  0x4d   : > { %1114 = vmatpush1.bf16.msra.mxu1 %v1543_v3 }
  0x4e   : > { %1115 = vmatprep.subr.bf16.mxu1 %v1558_v36 }
  0x4f   : > { %1459 = vmatmul.mubr.msk.bf16.gmra.mrb[20].mxu0 %vm726_vm0, %v1545_v4 }
  0x51   : > { %1116 = vmatpush1.bf16.msra.mxu1 %v1546_v5 }
  0x52   : > { %1117 = vmatprep.subr.bf16.mxu1 %v1558_v36 }
  0x55   : > { %1118 = vmatpush1.bf16.msra.mxu1 %v1547_v6 }
  0x58   : > { %1128 = vmatmul.mubr.bf16.vlgmr.msra.gmra.mrb[16].mxu1 %v1330_v7 }
  0xfa   : > { %v1374_v8 = vpop.f32.mrb[0].mxu0 }
  0xfb   : > { %v1414_v9 = vpop.f32.mrb[0].mxu1  ;;  %v1375_v11 = vpop.f32.mrb[1].mxu0 }
  0xfc   : > { %v1376_v12 = vadd.f32 %v1375_v11, %v1374_v8  ;;  %v1415_v13 = vpop.f32.mrb[1].mxu1  ;;  %v1377_v14 = vpop.f32.mrb[2].mxu0 }
  0xfd   : > { %v1416_v15 = vadd.f32 %v1415_v13, %v1414_v9  ;;  %v1417_v16 = vpop.f32.mrb[2].mxu1  ;;  %v1378_v17 = vpop.f32.mrb[3].mxu0  ;;  %v1325_v13 = vld [vmem:[%s1838_s2 + $0x1] ss:$0 sm:$0xff] }
  0xfe   : > { %v774_v18 = vadd.f32 %v1376_v12, %v1264_v10  ;;  %v1379_v19 = vadd.f32 %v1378_v17, %v1377_v14  ;;  %v1418_v20 = vpop.f32.mrb[3].mxu1 }
  0xff   : > { %v1419_v21 = vadd.f32 %v1418_v20, %v1417_v16 }
 0x100   : > { %v777_v22 = vadd.f32 %v1379_v19, %v1264_v10  ;;  %v839_v23 = vadd.f32 %v1416_v15, %v774_v18 }
 0x102   : > { %v1380_v24 = vpop.f32.mrb[4].mxu0  ;;  %v842_v25 = vadd.f32 %v1419_v21, %v777_v22 }
 0x103   : > { %v1381_v26 = vpop.f32.mrb[5].mxu0  ;;  %v1420_v29 = vpop.f32.mrb[4].mxu1 }
 0x104   : > { %v1382_v27 = vadd.f32 %v1381_v26, %v1380_v24  ;;  %v1383_v28 = vpop.f32.mrb[6].mxu0  ;;  %v1421_v33 = vpop.f32.mrb[5].mxu1 }
 0x105   : > { %v1384_v30 = vpop.f32.mrb[7].mxu0  ;;  %v1422_v34 = vadd.f32 %v1421_v33, %v1420_v29  ;;  %v1423_v35 = vpop.f32.mrb[6].mxu1 }
 0x106   : > { %v782_v31 = vadd.f32 %v1382_v27, %v1264_v10  ;;  %v1385_v32 = vadd.f32 %v1384_v30, %v1383_v28  ;;  %v1424_v37 = vpop.f32.mrb[7].mxu1 }
 0x107   : > { %v1425_v38 = vadd.f32 %v1424_v37, %v1423_v35 }
 0x108   : > { %v785_v36 = vadd.f32 %v1385_v32, %v1264_v10  ;;  %v847_v39 = vadd.f32 %v1422_v34, %v782_v31 }
 0x10a   : > { %v1386_v40 = vpop.f32.mrb[8].mxu0  ;;  %v850_v42 = vadd.f32 %v1425_v38, %v785_v36 }
 0x10b   : > { %v1387_v41 = vpop.f32.mrb[9].mxu0  ;;  %v1426_v46 = vpop.f32.mrb[8].mxu1 }
 0x10c   : > { %v1388_v43 = vadd.f32 %v1387_v41, %v1386_v40  ;;  %v1389_v44 = vpop.f32.mrb[10].mxu0  ;;  %v1427_v49 = vpop.f32.mrb[9].mxu1 }
 0x10d   : > { %v1390_v45 = vpop.f32.mrb[11].mxu0  ;;  %v1428_v50 = vadd.f32 %v1427_v49, %v1426_v46  ;;  %v1429_v51 = vpop.f32.mrb[10].mxu1  ;;  %v1329_v49 = vld [vmem:[%s1841_s5] ss:$0 sm:$0xff] }
 0x10e   : > { %v790_v47 = vadd.f32 %v1388_v43, %v1264_v10  ;;  %v1391_v48 = vadd.f32 %v1390_v45, %v1389_v44  ;;  %v1430_v53 = vpop.f32.mrb[11].mxu1 }
 0x10f   : > { %v1431_v54 = vadd.f32 %v1430_v53, %v1429_v51 }
 0x110   : > { %v793_v52 = vadd.f32 %v1391_v48, %v1264_v10  ;;  %v855_v55 = vadd.f32 %v1428_v50, %v790_v47 }
 0x112   : > { %v1392_v56 = vpop.f32.mrb[12].mxu0  ;;  %v858_v58 = vadd.f32 %v1431_v54, %v793_v52 }
 0x113   : > { %v1393_v57 = vpop.f32.mrb[13].mxu0  ;;  %v1432_v62 = vpop.f32.mrb[12].mxu1 }
 0x114   : > { %v1394_v59 = vadd.f32 %v1393_v57, %v1392_v56  ;;  %v1395_v60 = vpop.f32.mrb[14].mxu0  ;;  %v1433_v1 = vpop.f32.mrb[13].mxu1 }
 0x115   : > { %v1396_v61 = vpop.f32.mrb[15].mxu0  ;;  %v1434_v2 = vadd.f32 %v1433_v1, %v1432_v62  ;;  %v1435_v3 = vpop.f32.mrb[14].mxu1 }
 0x116   : > { %v798_v63 = vadd.f32 %v1394_v59, %v1264_v10  ;;  %v1397_v0 = vadd.f32 %v1396_v61, %v1395_v60  ;;  %v1436_v5 = vpop.f32.mrb[15].mxu1 }
 0x117   : > { %v1437_v6 = vadd.f32 %v1436_v5, %v1435_v3 }
 0x118   : > { %v801_v4 = vadd.f32 %v1397_v0, %v1264_v10  ;;  %v863_v7 = vadd.f32 %v1434_v2, %v798_v63  ;;  %v1326_v10 = vld [vmem:[%s1838_s2 + $0x2] ss:$0 sm:$0xff] }
 0x119   : > { %v1346_v0 = vld [vmem:[%s1841_s5 + $0x2] ss:$0 sm:$0xff] }
 0x11a   : > { %v1456_v8 = vpop.f32.mrb[16].mxu0  ;;  %v866_v12 = vadd.f32 %v1437_v6, %v801_v4 }
 0x11b   : > { %v912_v9 = vadd.f32 %v1456_v8, %v847_v39  ;;  %v903_v11 = vpop.f32.mrb[17].mxu0 }
 0x11c   : > { %v904_v14 = vadd.f32 %v903_v11, %v839_v23  ;;  %v1457_v15 = vpop.f32.mrb[18].mxu0 }
 0x11d   : > { %v936_v16 = vmax.f32 %v912_v9, 0.0  ;;  %v915_v17 = vadd.f32 %v1457_v15, %v850_v42  ;;  %v906_v18 = vpop.f32.mrb[19].mxu0 }
 0x11e   : > { %v934_v19 = vmax.f32 %v904_v14, 0.0  ;;  %v907_v20 = vadd.f32 %v906_v18, %v842_v25 }
 0x11f   : > { %v949_v21 = vmul.f32 %v1325_v13, %v936_v16  ;;  %v937_v22 = vmax.f32 %v915_v17, 0.0 }
 0x120   : > { %v947_v24 = vmul.f32 %v1325_v13, %v934_v19  ;;  %v935_v26 = vmax.f32 %v907_v20, 0.0 }
 0x121   : > { %v962_v27 = vadd.f32 %v1326_v10, %v949_v21  ;;  %v950_v28 = vmul.f32 %v1325_v13, %v937_v22 }
 0x122   : > { %v960_v29 = vadd.f32 %v1326_v10, %v947_v24  ;;  %v948_v30 = vmul.f32 %v1325_v13, %v935_v26  ;;  %v1460_v31 = vpop.f32.mrb[20].mxu0 }
 0x123   : > { %v963_v23 = vadd.f32 %v1326_v10, %v950_v28  ;;  %v928_v32 = vadd.f32 %v1460_v31, %v863_v7  ;;  %v919_v33 = vpop.f32.mrb[21].mxu0 }
 0x124   : > { %v968_v34 = vmax.f32 %v960_v29, %v962_v27  ;;  %v961_v35 = vadd.f32 %v1326_v10, %v948_v30  ;;  %v920_v36 = vadd.f32 %v919_v33, %v855_v55  ;;  %v1461_v37 = vpop.f32.mrb[22].mxu0 }
 0x125   : > { %v940_v38 = vmax.f32 %v928_v32, 0.0  ;;  %v931_v39 = vadd.f32 %v1461_v37, %v866_v12  ;;  %v922_v40 = vpop.f32.mrb[23].mxu0 }
 0x126   : > { %v969_v25 = vmax.f32 %v961_v35, %v963_v23  ;;  %v938_v41 = vmax.f32 %v920_v36, 0.0  ;;  %v923_v42 = vadd.f32 %v922_v40, %v858_v58  ;;  %v1345_v58 = vld [vmem:[%s1841_s5 + $0x1] ss:$0 sm:$0xff] }
 0x127   : > { %v953_v43 = vmul.f32 %v1325_v13, %v940_v38  ;;  %v941_v44 = vmax.f32 %v931_v39, 0.0 }
 0x128   : > { %v951_v45 = vmul.f32 %v1325_v13, %v938_v41  ;;  %v939_v46 = vmax.f32 %v923_v42, 0.0 }
 0x129   : > { %v966_v47 = vadd.f32 %v1326_v10, %v953_v43  ;;  %v954_v48 = vmul.f32 %v1325_v13, %v941_v44 }
 0x12a   : > { %v964_v50 = vadd.f32 %v1326_v10, %v951_v45  ;;  %v952_v51 = vmul.f32 %v1325_v13, %v939_v46 }
 0x12b   : > { %v967_v52 = vadd.f32 %v1326_v10, %v954_v48  ;;  %v1129_v53 = vpop.f32.mrb[16].mxu1 }
 0x12c   : > { %v970_v54 = vmax.f32 %v964_v50, %v966_v47  ;;  %v965_v55 = vadd.f32 %v1326_v10, %v952_v51  ;;  %v1130_v56 = vadd.f32 %v1329_v49, %v1129_v53  ;;  %v1131_v57 = vpop.f32.mrb[17].mxu1 }
 0x12d   : > { %v1132_v59 = vpop.f32.mrb[18].mxu1 }
 0x12e   : > { %v972_v60 = vmax.f32 %v968_v34, %v970_v54  ;;  %v971_v61 = vmax.f32 %v965_v55, %v967_v52  ;;  %v1135_v62 = vmax.f32 %v1130_v56, 0.0  ;;  %v1133_v63 = vpop.f32.mrb[19].mxu1 }
 0x130   : > { %v973_v1 = vmax.f32 %v969_v25, %v971_v61  ;;  %v1141_v2 = vmul.f32 %v1345_v58, %v1135_v62 }
 0x132   : > { %v1356_v3 = vpack.c.bf16 %v973_v1, %v972_v60  ;;  %v1147_v4 = vadd.f32 %v1346_v0, %v1141_v2 }
 0x134   : > { %1357 = vst [vmem:[%s304_s18] sm:$0xff] %v1356_v3   ;;  %v1149_v5 = vrot.slane %v1147_v4, 4 }
 0x136   : > { %v1151_v6 = vmax.f32 %v1147_v4, %v1149_v5 }
 0x138   : > { %v1153_v7 = vsel %vm1152_vm1, %v1151_v6, 0.0 }
 0x139   : > { %v1154_v8 = vrot.slane %v1153_v7, 4 }
 0x13b   : > { %v1155_v9 = vadd.f32 %v1154_v8, %v1153_v7 }
 0x13d   : > { %v1156_v11 = vrot.slane %v1155_v9, 2 }
 0x13f   : > { %v1157_v12 = vadd.f32 %v1156_v11, %v1155_v9 }
 0x141   : > { %v1158_v13 = vrot.slane %v1157_v12, 1 }
 0x143   : > { %v1159_v14 = vadd.f32 %v1158_v13, %v1157_v12 }
 0x145   : > { %v1160_v15 = vmul.f32 0.25, %v1159_v14 }
 0x147   : > { %1161 = vst [vmem:[%s307_s21] sm:$0x1] %v1160_v15 }
 0x148 PF: > { %s18_s24 = sadd.s32 1, %s1556_s24  }
 0x149   : > { %p15_p4 = scmp.ge.s32.totalorder %s18_s24, 4  }
 0x14b   :  { %17 = sbr.rel (!%p15_p4) target bundleno = 1 (0x1), region = 89 }

// kernel: spectro_eda_net_forward.5
= control target key start
LH: loop header
LB: loop body
LE: loop exit
PB: predicated region body
PF: predicated region fallthrough
CT: control target
= control target key end

     0   :  { %vm2755_vm0 = vmmov 0   ;;  %vm1012_vm1 = vcmask 64512   ;;  %vm1264_vm2 = vcmask 523264   ;;  %vm1982_vm3 = vcmask 9216   ;;  %s3473_s1 = inlined_call_operand.vmem [shape: bf16[1152,128], index: 1, kind: input, shape index: {}]   ;;  %s3474_s0 = inlined_call_operand.vmem [shape: bf16[32,1152], index: 0, kind: input, shape index: {}]   ;;  %s3475_s6 = inlined_call_operand.vmem [shape: bf16[64,768], index: 6, kind: input, shape index: {}]   ;;  %s3476_s2 = inlined_call_operand.vmem [shape: f32[3,128], index: 2, kind: input, shape index: {}]   ;;  %s3477_s3 = inlined_call_operand.vmem [shape: f32[2,8], index: 3, kind: input, shape index: {}]   ;;  %s3478_s5 = inlined_call_operand.vmem [shape: f32[2,64], index: 5, kind: input, shape index: {}]   ;;  %s3479_s8 = inlined_call_operand.vmem [shape: bf16[256,128], index: 8, kind: input, shape index: {}]   ;;  %s3480_s10 = inlined_call_operand.vmem [shape: bf16[128,128], index: 10, kind: input, shape index: {}]   ;;  %s3481_s7 = inlined_call_operand.vmem [shape: f32[1,768], index: 7, kind: input, shape index: {}]   ;;  %s3482_s12 = inlined_call_operand.vmem [shape: f32[384,2], index: 12, kind: input, shape index: {}]   ;;  %s3483_s4 = inlined_call_operand.vmem [shape: f32[2,128], index: 4, kind: input, shape index: {}]   ;;  %s3484_s9 = inlined_call_operand.vmem [shape: f32[1,128], index: 9, kind: input, shape index: {}]   ;;  %s3485_s11 = inlined_call_operand.vmem [shape: f32[1,128], index: 11, kind: input, shape index: {}]   ;;  %s3486_s13 = inlined_call_operand.vmem [shape: f32[1,2], index: 13, kind: input, shape index: {}]   ;;  %s3487_s14 = inlined_call_operand.vmem [shape: f32[2,2], index: 14, kind: output, shape index: {}]  }
   0x1   :  { %v2572_v0 = vld [vmem:[%s3473_s1 + $0x40] sm:$0xff]   ;;  %v2576_v4 = vld [vmem:[%s3473_s1 + $0x48] sm:$0xff]   ;;  %v2580_v8 = vld [vmem:[%s3473_s1 + $0x50] sm:$0xff]  }
   0x2   :  { %v2573_v1 = vld [vmem:[%s3473_s1] sm:$0xff]   ;;  %2140 = vmatprep.subr.bf16.mxu0 %v2572_v0  ;;  %v2577_v5 = vld [vmem:[%s3473_s1 + $0x8] sm:$0xff]   ;;  %v2581_v9 = vld [vmem:[%s3473_s1 + $0x10] sm:$0xff]  }
   0x3   :  { %v2574_v2 = vld [vmem:[%s3473_s1 + $0xc0] sm:$0xff]   ;;  %2141 = vmatpush3.bf16.msra.mxu0 %v2573_v1  ;;  %v2578_v6 = vld [vmem:[%s3473_s1 + $0xc8] sm:$0xff]   ;;  %v2582_v10 = vld [vmem:[%s3473_s1 + $0xd0] sm:$0xff]  }
   0x4   :  { %v2575_v3 = vld [vmem:[%s3473_s1 + $0x80] sm:$0xff]   ;;  %2168 = vmatprep.subr.bf16.mxu1 %v2574_v2  ;;  %2142 = vmatprep.subr.bf16.mxu0 %v2576_v4  ;;  %v2579_v7 = vld [vmem:[%s3473_s1 + $0x88] sm:$0xff]   ;;  %v2583_v11 = vld [vmem:[%s3473_s1 + $0x90] sm:$0xff]  }
   0x5   :  { %2169 = vmatpush3.bf16.msra.mxu1 %v2575_v3  ;;  %v2584_v12 = vld [vmem:[%s3473_s1 + $0x58] sm:$0xff]   ;;  %v2588_v16 = vld [vmem:[%s3473_s1 + $0x60] sm:$0xff]   ;;  %v2592_v20 = vld [vmem:[%s3473_s1 + $0x68] sm:$0xff]  }
   0x6   :  { %2170 = vmatprep.subr.bf16.mxu1 %v2578_v6  ;;  %v2585_v13 = vld [vmem:[%s3473_s1 + $0x18] sm:$0xff]   ;;  %v2589_v17 = vld [vmem:[%s3473_s1 + $0x20] sm:$0xff]   ;;  %v2593_v21 = vld [vmem:[%s3473_s1 + $0x28] sm:$0xff]  }
   0x7   :  { %2143 = vmatpush3.bf16.msra.mxu0 %v2577_v5  ;;  %v2586_v14 = vld [vmem:[%s3473_s1 + $0xd8] sm:$0xff]   ;;  %v2590_v18 = vld [vmem:[%s3473_s1 + $0xe0] sm:$0xff]   ;;  %v2594_v22 = vld [vmem:[%s3473_s1 + $0xe8] sm:$0xff]  }
   0x8   :  { %2144 = vmatprep.subr.bf16.mxu0 %v2580_v8  ;;  %v2587_v15 = vld [vmem:[%s3473_s1 + $0x98] sm:$0xff]   ;;  %v2591_v19 = vld [vmem:[%s3473_s1 + $0xa0] sm:$0xff]   ;;  %v2595_v23 = vld [vmem:[%s3473_s1 + $0xa8] sm:$0xff]  }
   0x9   :  { %2171 = vmatpush3.bf16.msra.mxu1 %v2579_v7  ;;  %v2596_v24 = vld [vmem:[%s3473_s1 + $0x70] sm:$0xff]   ;;  %v2600_v28 = vld [vmem:[%s3473_s1 + $0x78] sm:$0xff]   ;;  %v2603_v31 = vld [vmem:[%s3474_s0] ss:$36 sps:$4 sm:$0xff]  }
   0xa   :  { %2172 = vmatprep.subr.bf16.mxu1 %v2582_v10  ;;  %v2597_v25 = vld [vmem:[%s3473_s1 + $0x30] sm:$0xff]   ;;  %v2601_v29 = vld [vmem:[%s3473_s1 + $0x38] sm:$0xff]   ;;  %v2605_v32 = vld [vmem:[%s3474_s0 + $0x4] ss:$36 sps:$4 sm:$0xff]  }
   0xb   :  { %2145 = vmatpush3.bf16.msra.mxu0 %v2581_v9  ;;  %v2598_v26 = vld [vmem:[%s3473_s1 + $0xf0] sm:$0xff]   ;;  %v2602_v30 = vld [vmem:[%s3473_s1 + $0xf8] sm:$0xff]   ;;  %773 = vmatprep.mubr.bf16.mxu0 %v2605_v32  ;;  %v2607_v34 = vld [vmem:[%s3473_s1 + $0x140] sm:$0xff]  }
   0xc   :  { %2146 = vmatprep.subr.bf16.mxu0 %v2584_v12  ;;  %v2599_v27 = vld [vmem:[%s3473_s1 + $0xb0] sm:$0xff]   ;;  %v2606_v33 = vld [vmem:[%s3473_s1 + $0xb8] sm:$0xff]   ;;  %v2608_v35 = vld [vmem:[%s3474_s0 + $0x8] ss:$36 sps:$4 sm:$0xff]  }
   0xd   :  { %2173 = vmatpush3.bf16.msra.mxu1 %v2583_v11  ;;  %v2610_v36 = vld [vmem:[%s3474_s0 + $0xc] ss:$36 sps:$4 sm:$0xff]   ;;  %v2611_v37 = vld [vmem:[%s3473_s1 + $0x100] sm:$0xff]   ;;  %v2622_v48 = vld [vmem:[%s3473_s1 + $0x158] sm:$0xff]  }
   0xe   :  { %2174 = vmatprep.subr.bf16.mxu1 %v2586_v14  ;;  %822 = vmatprep.mubr.bf16.mxu1 %v2610_v36  ;;  %v2612_v38 = vld [vmem:[%s3473_s1 + $0x1c0] sm:$0xff]   ;;  %v2614_v40 = vld [vmem:[%s3473_s1 + $0x148] sm:$0xff]   ;;  %v2618_v44 = vld [vmem:[%s3473_s1 + $0x150] sm:$0xff]  }
   0xf   :  { %2147 = vmatpush3.bf16.msra.mxu0 %v2585_v13  ;;  %v2613_v39 = vld [vmem:[%s3473_s1 + $0x180] sm:$0xff]   ;;  %v2615_v41 = vld [vmem:[%s3473_s1 + $0x108] sm:$0xff]   ;;  %v2619_v45 = vld [vmem:[%s3473_s1 + $0x110] sm:$0xff]  }
  0x10   :  { %2148 = vmatprep.subr.bf16.mxu0 %v2588_v16  ;;  %v2616_v42 = vld [vmem:[%s3473_s1 + $0x1c8] sm:$0xff]   ;;  %v2620_v46 = vld [vmem:[%s3473_s1 + $0x1d0] sm:$0xff]   ;;  %v2623_v49 = vld [vmem:[%s3473_s1 + $0x118] sm:$0xff]  }
  0x11   :  { %2175 = vmatpush3.bf16.msra.mxu1 %v2587_v15  ;;  %v2617_v43 = vld [vmem:[%s3473_s1 + $0x188] sm:$0xff]   ;;  %v2621_v47 = vld [vmem:[%s3473_s1 + $0x190] sm:$0xff]   ;;  %v2624_v50 = vld [vmem:[%s3473_s1 + $0x1d8] sm:$0xff]  }
  0x12   :  { %2176 = vmatprep.subr.bf16.mxu1 %v2590_v18  ;;  %v2625_v51 = vld [vmem:[%s3473_s1 + $0x198] sm:$0xff]   ;;  %v2626_v52 = vld [vmem:[%s3473_s1 + $0x160] sm:$0xff]   ;;  %v2630_v56 = vld [vmem:[%s3473_s1 + $0x168] sm:$0xff]  }
  0x13   :  { %2149 = vmatpush3.bf16.msra.mxu0 %v2589_v17  ;;  %v2627_v53 = vld [vmem:[%s3473_s1 + $0x120] sm:$0xff]   ;;  %v2631_v57 = vld [vmem:[%s3474_s0 + $0x4c] ss:$36 sps:$4 sm:$0xff]   ;;  %v2636_v61 = vld [vmem:[%s3474_s0 + $0x54] ss:$36 sps:$4 sm:$0xff]  }
  0x14   :  { %2150 = vmatprep.subr.bf16.mxu0 %v2592_v20  ;;  %v2628_v54 = vld [vmem:[%s3473_s1 + $0x1e0] sm:$0xff]   ;;  %v2633_v58 = vld [vmem:[%s3473_s1 + $0x128] sm:$0xff]   ;;  %v2639_v63 = vld [vmem:[%s3474_s0 + $0x50] ss:$36 sps:$4 sm:$0xff]  }
  0x15   :  { %2177 = vmatpush3.bf16.msra.mxu1 %v2591_v19  ;;  %v2629_v55 = vld [vmem:[%s3473_s1 + $0x1a0] sm:$0xff]   ;;  %v2634_v59 = vld [vmem:[%s3474_s0 + $0x48] ss:$36 sps:$4 sm:$0xff]   ;;  %v2640_v0 = vld [vmem:[%s3473_s1 + $0x170] sm:$0xff]  }
  0x16   :  { %2178 = vmatprep.subr.bf16.mxu1 %v2594_v22  ;;  %v2635_v60 = vld [vmem:[%s3473_s1 + $0x1e8] sm:$0xff]   ;;  %v2641_v1 = vld [vmem:[%s3473_s1 + $0x130] sm:$0xff]   ;;  %v2644_v4 = vld [vmem:[%s3473_s1 + $0x178] sm:$0xff]  }
  0x17   :  { %2151 = vmatpush3.bf16.msra.mxu0 %v2593_v21  ;;  %v2638_v62 = vld [vmem:[%s3473_s1 + $0x1a8] sm:$0xff]   ;;  %v2642_v2 = vld [vmem:[%s3473_s1 + $0x1f0] sm:$0xff]   ;;  %v2645_v5 = vld [vmem:[%s3473_s1 + $0x138] sm:$0xff]  }
  0x18   :  { %2152 = vmatprep.subr.bf16.mxu0 %v2596_v24  ;;  %v2643_v3 = vld [vmem:[%s3473_s1 + $0x1b0] sm:$0xff]   ;;  %v2646_v6 = vld [vmem:[%s3473_s1 + $0x1f8] sm:$0xff]   ;;  %v2651_v10 = vld [vmem:[%s3473_s1 + $0x200] sm:$0xff]  }
  0x19   :  { %2179 = vmatpush3.bf16.msra.mxu1 %v2595_v23  ;;  %v2647_v7 = vld [vmem:[%s3474_s0 + $0x10] ss:$36 sps:$4 sm:$0xff]   ;;  %v2650_v9 = vld [vmem:[%s3473_s1 + $0x1b8] sm:$0xff]   ;;  %v2655_v13 = vld [vmem:[%s3473_s1 + $0x208] sm:$0xff]  }
  0x1a   :  { %2180 = vmatprep.subr.bf16.mxu1 %v2598_v26  ;;  %v2649_v8 = vld [vmem:[%s3474_s0 + $0x14] ss:$36 sps:$4 sm:$0xff]   ;;  %v2654_v12 = vld [vmem:[%s3474_s0 + $0x1c] ss:$36 sps:$4 sm:$0xff]   ;;  %v2660_v17 = vld [vmem:[%s3474_s0 + $0x64] ss:$36 sps:$4 sm:$0xff]  }
  0x1b   :  { %2153 = vmatpush3.bf16.msra.mxu0 %v2597_v25  ;;  %v2652_v11 = vld [vmem:[%s3474_s0 + $0x18] ss:$36 sps:$4 sm:$0xff]   ;;  %v2659_v16 = vld [vmem:[%s3473_s1 + $0x210] sm:$0xff]   ;;  %v2662_v18 = vld [vmem:[%s3474_s0 + $0x60] ss:$36 sps:$4 sm:$0xff]   ;;  %v2754_v26 = vmov 0.0  }
  0x1c   :  { %2154 = vmatprep.subr.bf16.mxu0 %v2600_v28  ;;  %v2656_v14 = vld [vmem:[%s3474_s0 + $0x5c] ss:$36 sps:$4 sm:$0xff]   ;;  %v2665_v22 = vld [vmem:[%s3473_s1 + $0x228] sm:$0xff]   ;;  %v2666_v23 = vld [vmem:[%s3473_s1 + $0x230] sm:$0xff]  }
  0x1d   :  { %2181 = vmatpush3.bf16.msra.mxu1 %v2599_v27  ;;  %v2658_v15 = vld [vmem:[%s3474_s0 + $0x58] ss:$36 sps:$4 sm:$0xff]   ;;  %v2664_v20 = vld [vmem:[%s3473_s1 + $0x220] sm:$0xff]   ;;  %v2669_v25 = vld [vmem:[%s3474_s0 + $0x68] ss:$36 sps:$4 sm:$0xff]  }
  0x1e   :  { %2182 = vmatprep.subr.bf16.mxu1 %v2602_v30  ;;  %v2663_v19 = vld [vmem:[%s3473_s1 + $0x218] sm:$0xff]   ;;  %v2668_v21 = vld [vmem:[%s3474_s0 + $0x20] ss:$36 sps:$4 sm:$0xff]  }
  0x1f   :  { %2155 = vmatpush3.bf16.msra.mxu0 %v2601_v29  ;;  %v2667_v24 = vld [vmem:[%s3473_s1 + $0x238] sm:$0xff]   ;;  %v1988_v28 = vld [vmem:[%s3476_s2] ss:$0 sm:$0xff] }
  0x20   :  { %2196 = vmatprep.subr.bf16.mxu0 %v2607_v34 }
  0x21   :  { %2183 = vmatpush3.bf16.msra.mxu1 %v2606_v33 }
  0x22   :  { %774 = vmatmul.mubr.bf16.vlgmr.msra.gmra.mrb[0].mxu0 %v2603_v31  ;;  %2224 = vmatprep.subr.bf16.mxu1 %v2612_v38 }
  0x23   :  { %2197 = vmatpush3.bf16.msra.mxu0 %v2611_v37  ;;  %781 = vmatprep.mubr.bf16.mxu0 %v2631_v57 }
  0x24   :  { %823 = vmatmul.mubr.bf16.vlgmr.msra.gmra.mrb[0].mxu1 %v2608_v35  ;;  %2198 = vmatprep.subr.bf16.mxu0 %v2614_v40 }
  0x25   :  { %2225 = vmatpush3.bf16.msra.mxu1 %v2613_v39  ;;  %830 = vmatprep.mubr.bf16.mxu1 %v2636_v61 }
  0x26   :  { %2226 = vmatprep.subr.bf16.mxu1 %v2616_v42 }
  0x27   :  { %2199 = vmatpush3.bf16.msra.mxu0 %v2615_v41 }
  0x28   :  { %2200 = vmatprep.subr.bf16.mxu0 %v2618_v44 }
  0x29   :  { %2227 = vmatpush3.bf16.msra.mxu1 %v2617_v43 }
  0x2a   :  { %2228 = vmatprep.subr.bf16.mxu1 %v2620_v46  ;;  %782 = vmatmul.mubr.bf16.gmra.mrb[4].mxu0 %v2634_v59 }
  0x2b   :  { %2201 = vmatpush3.bf16.msra.mxu0 %v2619_v45  ;;  %871 = vmatprep.mubr.bf16.mxu0 %v2649_v8 }
  0x2c   :  { %2202 = vmatprep.subr.bf16.mxu0 %v2622_v48  ;;  %831 = vmatmul.mubr.bf16.gmra.mrb[4].mxu1 %v2639_v63 }
  0x2d   :  { %2229 = vmatpush3.bf16.msra.mxu1 %v2621_v47  ;;  %920 = vmatprep.mubr.bf16.mxu1 %v2654_v12 }
  0x2e   :  { %2230 = vmatprep.subr.bf16.mxu1 %v2624_v50 }
  0x2f   :  { %2203 = vmatpush3.bf16.msra.mxu0 %v2623_v49 }
  0x30   :  { %2204 = vmatprep.subr.bf16.mxu0 %v2626_v52 }
  0x31   :  { %2231 = vmatpush3.bf16.msra.mxu1 %v2625_v51 }
  0x32   :  { %2232 = vmatprep.subr.bf16.mxu1 %v2628_v54 }
  0x33   :  { %2205 = vmatpush3.bf16.msra.mxu0 %v2627_v53 }
  0x34   :  { %2206 = vmatprep.subr.bf16.mxu0 %v2630_v56 }
  0x35   :  { %2233 = vmatpush3.bf16.msra.mxu1 %v2629_v55 }
  0x36   :  { %2234 = vmatprep.subr.bf16.mxu1 %v2635_v60 }
  0x37   :  { %2207 = vmatpush3.bf16.msra.mxu0 %v2633_v58 }
  0x38   :  { %2208 = vmatprep.subr.bf16.mxu0 %v2640_v0 }
  0x39   :  { %2235 = vmatpush3.bf16.msra.mxu1 %v2638_v62 }
  0x3a   :  { %2236 = vmatprep.subr.bf16.mxu1 %v2642_v2 }
  0x3b   :  { %2209 = vmatpush3.bf16.msra.mxu0 %v2641_v1 }
  0x3c   :  { %2210 = vmatprep.subr.bf16.mxu0 %v2644_v4 }
  0x3d   :  { %2237 = vmatpush3.bf16.msra.mxu1 %v2643_v3 }
  0x3e   :  { %2238 = vmatprep.subr.bf16.mxu1 %v2646_v6 }
  0x3f   :  { %2211 = vmatpush3.bf16.msra.mxu0 %v2645_v5 }
  0x40   :  { %2346 = vmatprep.subr.bf16.mxu0 %v2651_v10 }
  0x41   :  { %2239 = vmatpush3.bf16.msra.mxu1 %v2650_v9 }
  0x42   :  { %872 = vmatmul.mubr.bf16.vlgmr.msra.gmra.mrb[8].mxu0 %v2647_v7  ;;  %2366 = vmatprep.subr.mxu1 %v2754_v26 }
  0x43   :  { %2347 = vmatpush3.bf16.msra.mxu0 %v2651_v10  ;;  %879 = vmatprep.mubr.bf16.mxu0 %v2656_v14 }
  0x44   :  { %921 = vmatmul.mubr.bf16.vlgmr.msra.gmra.mrb[8].mxu1 %v2652_v11  ;;  %2348 = vmatprep.subr.bf16.mxu0 %v2655_v13 }
  0x45   :  { %928 = vmatprep.mubr.bf16.mxu1 %v2660_v17 }
  0x47   :  { %2349 = vmatpush3.bf16.msra.mxu0 %v2655_v13 }
  0x48   :  { %2350 = vmatprep.subr.bf16.mxu0 %v2659_v16 }
  0x4a   :  { %880 = vmatmul.mubr.bf16.gmra.mrb[12].mxu0 %v2658_v15 }
  0x4b   :  { %2351 = vmatpush3.bf16.msra.mxu0 %v2659_v16  ;;  %2362 = vmatprep.mubr.bf16.mxu0 %v2668_v21 }
  0x4c   :  { %929 = vmatmul.mubr.bf16.gmra.mrb[12].mxu1 %v2662_v18  ;;  %2352 = vmatprep.subr.bf16.mxu0 %v2663_v19 }
  0x4d   :  { %2368 = vmatprep.mubr.msk.f32.mxu1 %vm2755_vm0, %v2754_v26 }
  0x4f   :  { %2353 = vmatpush3.bf16.msra.mxu0 %v2663_v19 }
  0x50   :  { %2354 = vmatprep.subr.bf16.mxu0 %v2664_v20 }
  0x53   :  { %2355 = vmatpush3.bf16.msra.mxu0 %v2664_v20 }
  0x54   :  { %2356 = vmatprep.subr.bf16.mxu0 %v2665_v22 }
  0x57   :  { %2357 = vmatpush3.bf16.msra.mxu0 %v2665_v22 }
  0x58   :  { %2358 = vmatprep.subr.bf16.mxu0 %v2666_v23 }
  0x5b   :  { %2359 = vmatpush3.bf16.msra.mxu0 %v2666_v23 }
  0x5c   :  { %2360 = vmatprep.subr.bf16.mxu0 %v2667_v24 }
  0x5f   :  { %2361 = vmatpush3.bf16.msra.mxu0 %v2667_v24 }
  0x62   :  { %2363 = vmatmul.mubr.bf16.vlgmr.msra.gmra.mrb[16].mxu0 %v2669_v25 }
  0xf5   :  { %v2156_v27 = vpop.f32.mrb[0].mxu0 }
  0xf6   :  { %v2157_v29 = vpop.f32.mrb[1].mxu0 }
  0xf7   :  { %v2158_v30 = vadd.f32 %v2157_v29, %v2156_v27  ;;  %v2159_v31 = vpop.f32.mrb[2].mxu0  ;;  %v2184_v32 = vpop.f32.mrb[0].mxu1 }
  0xf8   :  { %v2160_v33 = vpop.f32.mrb[3].mxu0  ;;  %v2185_v36 = vpop.f32.mrb[1].mxu1 }
  0xf9   :  { %v776_v34 = vadd.f32 %v2158_v30, %v1988_v28  ;;  %v2161_v35 = vadd.f32 %v2160_v33, %v2159_v31  ;;  %v2186_v37 = vadd.f32 %v2185_v36, %v2184_v32  ;;  %v2187_v38 = vpop.f32.mrb[2].mxu1  ;;  %v2079_v32 = vld [vmem:[%s3476_s2 + $0x1] ss:$0 sm:$0xff] }
  0xfa   :  { %v2188_v40 = vpop.f32.mrb[3].mxu1 }
  0xfb   :  { %v779_v39 = vadd.f32 %v2161_v35, %v1988_v28  ;;  %v825_v41 = vadd.f32 %v2186_v37, %v776_v34  ;;  %v2189_v42 = vadd.f32 %v2188_v40, %v2187_v38 }
  0xfd   :  { %v828_v43 = vadd.f32 %v2189_v42, %v779_v39  ;;  %v2162_v44 = vpop.f32.mrb[4].mxu0  ;;  %v2080_v42 = vld [vmem:[%s3476_s2 + $0x2] ss:$0 sm:$0xff] }
  0xfe   :  { %v2163_v45 = vpop.f32.mrb[5].mxu0 }
  0xff   :  { %v2164_v46 = vadd.f32 %v2163_v45, %v2162_v44  ;;  %v2165_v47 = vpop.f32.mrb[6].mxu0  ;;  %v2190_v48 = vpop.f32.mrb[4].mxu1 }
 0x100   :  { %v2166_v49 = vpop.f32.mrb[7].mxu0  ;;  %v2191_v52 = vpop.f32.mrb[5].mxu1 }
 0x101   :  { %v784_v50 = vadd.f32 %v2164_v46, %v1988_v28  ;;  %v2167_v51 = vadd.f32 %v2166_v49, %v2165_v47  ;;  %v2192_v53 = vadd.f32 %v2191_v52, %v2190_v48  ;;  %v2193_v54 = vpop.f32.mrb[6].mxu1 }
 0x102   :  { %v2194_v56 = vpop.f32.mrb[7].mxu1 }
 0x103   :  { %v787_v55 = vadd.f32 %v2167_v51, %v1988_v28  ;;  %v833_v57 = vadd.f32 %v2192_v53, %v784_v50  ;;  %v2195_v58 = vadd.f32 %v2194_v56, %v2193_v54  ;;  %v2672_v53 = vld [vmem:[%s3475_s6 + $0x4] ss:$24 sps:$4 sm:$0xff]   ;;  %v1011_v56 = vld [vmem:[%s3477_s3] sm:$0x3] }
 0x105   :  { %v836_v59 = vadd.f32 %v2195_v58, %v787_v55  ;;  %v2670_v55 = vld [vmem:[%s3475_s6] ss:$24 sps:$4 sm:$0xff]   ;;  %v2673_v58 = vld [vmem:[%s3475_s6 + $0x30] ss:$24 sps:$4 sm:$0xff]  }
 0x115   :  { %v2212_v60 = vpop.f32.mrb[8].mxu0 }
 0x116   :  { %v2213_v61 = vpop.f32.mrb[9].mxu0 }
 0x117   :  { %v2214_v62 = vadd.f32 %v2213_v61, %v2212_v60  ;;  %v2215_v63 = vpop.f32.mrb[10].mxu0  ;;  %v2240_v0 = vpop.f32.mrb[8].mxu1  ;;  %v2678_v60 = vld [vmem:[%s3475_s6 + $0x64] ss:$24 sps:$4 sm:$0xff]   ;;  %v2676_v61 = vld [vmem:[%s3475_s6 + $0x60] ss:$24 sps:$4 sm:$0xff]  }
 0x118   :  { %v2216_v1 = vpop.f32.mrb[11].mxu0  ;;  %v2241_v4 = vpop.f32.mrb[9].mxu1 }
 0x119   :  { %v874_v2 = vadd.f32 %v2214_v62, %v825_v41  ;;  %v2217_v3 = vadd.f32 %v2216_v1, %v2215_v63  ;;  %v2242_v5 = vadd.f32 %v2241_v4, %v2240_v0  ;;  %v2243_v6 = vpop.f32.mrb[10].mxu1  ;;  %v2681_v62 = vld [vmem:[%s3475_s6 + $0x94] ss:$24 sps:$4 sm:$0xff]   ;;  %v2679_v63 = vld [vmem:[%s3475_s6 + $0x90] ss:$24 sps:$4 sm:$0xff]  }
 0x11a   :  { %v2244_v8 = vpop.f32.mrb[11].mxu1  ;;  %v1086_v0 = vld [vmem:[%s3478_s5] sm:$0x3]  ;;  %v2684_v1 = vld [vmem:[%s3475_s6 + $0xc] ss:$24 sps:$4 sm:$0xff]  }
 0x11b   :  { %v877_v7 = vadd.f32 %v2217_v3, %v828_v43  ;;  %v2245_v9 = vadd.f32 %v2244_v8, %v2243_v6  ;;  %v923_v10 = vadd.f32 %v2242_v5, %v874_v2  ;;  %v1087_v2 = vpack.c.bf16 %v1086_v0, %v1086_v0  ;;  %v2682_v3 = vld [vmem:[%s3475_s6 + $0x8] ss:$24 sps:$4 sm:$0xff]   ;;  %v2687_v4 = vld [vmem:[%s3475_s6 + $0x3c] ss:$24 sps:$4 sm:$0xff]   ;;  %v2685_v5 = vld [vmem:[%s3475_s6 + $0x38] ss:$24 sps:$4 sm:$0xff]  }
 0x11c   :  { %v2690_v6 = vld [vmem:[%s3475_s6 + $0x6c] ss:$24 sps:$4 sm:$0xff]   ;;  %v2693_v8 = vld [vmem:[%s3475_s6 + $0x9c] ss:$24 sps:$4 sm:$0xff]  }
 0x11d   :  { %v2218_v11 = vpop.f32.mrb[12].mxu0  ;;  %v926_v13 = vadd.f32 %v2245_v9, %v877_v7  ;;  %v2688_v7 = vld [vmem:[%s3475_s6 + $0x68] ss:$24 sps:$4 sm:$0xff]   ;;  %v2691_v9 = vld [vmem:[%s3475_s6 + $0x98] ss:$24 sps:$4 sm:$0xff]  }
 0x11e   :  { %v2219_v12 = vpop.f32.mrb[13].mxu0 }
 0x11f   :  { %v2220_v14 = vadd.f32 %v2219_v12, %v2218_v11  ;;  %v2221_v15 = vpop.f32.mrb[14].mxu0  ;;  %v2246_v16 = vpop.f32.mrb[12].mxu1  ;;  %v2694_v11 = vld [vmem:[%s3475_s6 + $0x10] ss:$24 sps:$4 sm:$0xff]   ;;  %v2699_v12 = vld [vmem:[%s3475_s6 + $0x44] ss:$24 sps:$4 sm:$0xff]  }
 0x120   :  { %v2222_v17 = vpop.f32.mrb[15].mxu0  ;;  %v2247_v20 = vpop.f32.mrb[13].mxu1 }
 0x121   :  { %v882_v18 = vadd.f32 %v2220_v14, %v833_v57  ;;  %v2223_v19 = vadd.f32 %v2222_v17, %v2221_v15  ;;  %v2248_v21 = vadd.f32 %v2247_v20, %v2246_v16  ;;  %v2249_v22 = vpop.f32.mrb[14].mxu1  ;;  %v2675_v57 = vld [vmem:[%s3475_s6 + $0x34] ss:$24 sps:$4 sm:$0xff]   ;;  %v2700_v15 = vld [vmem:[%s3475_s6 + $0x70] ss:$24 sps:$4 sm:$0xff]  }
 0x122   :  { %v2250_v24 = vpop.f32.mrb[15].mxu1  ;;  %v2702_v14 = vld [vmem:[%s3475_s6 + $0x74] ss:$24 sps:$4 sm:$0xff]   ;;  %v2705_v16 = vld [vmem:[%s3475_s6 + $0xa4] ss:$24 sps:$4 sm:$0xff]  }
 0x123   :  { %v885_v23 = vadd.f32 %v2223_v19, %v836_v59  ;;  %v2251_v25 = vadd.f32 %v2250_v24, %v2249_v22  ;;  %v931_v27 = vadd.f32 %v2248_v21, %v882_v18  ;;  %v2756_v59 = vmov 0   ;;  %v2703_v17 = vld [vmem:[%s3475_s6 + $0xa0] ss:$24 sps:$4 sm:$0xff]   ;;  %v2708_v20 = vld [vmem:[%s3479_s8 + $0x48] sm:$0xff]   ;;  %v2710_v22 = vld [vmem:[%s3479_s8 + $0x50] sm:$0xff]  }
 0x124   :  { %v2706_v18 = vld [vmem:[%s3479_s8 + $0x40] sm:$0xff]   ;;  %v2709_v21 = vld [vmem:[%s3479_s8 + $0x8] sm:$0xff]   ;;  %v2712_v24 = vld [vmem:[%s3479_s8 + $0x58] sm:$0xff]  }
 0x125   :  { %v934_v28 = vadd.f32 %v2251_v25, %v885_v23  ;;  %v2707_v19 = vld [vmem:[%s3479_s8] sm:$0xff]   ;;  %2264 = vmatprep.subr.bf16.mxu0 %v2706_v18  ;;  %v2711_v23 = vld [vmem:[%s3479_s8 + $0x10] sm:$0xff]   ;;  %v2713_v25 = vld [vmem:[%s3479_s8 + $0x18] sm:$0xff]  }
 0x126   :  { %2265 = vmatpush3.bf16.msra.mxu0 %v2707_v19 }
 0x127   :  { %2266 = vmatprep.subr.bf16.mxu0 %v2708_v20 }
 0x12a   :  { %2267 = vmatpush3.bf16.msra.mxu0 %v2709_v21 }
 0x12b   :  { %2268 = vmatprep.subr.bf16.mxu0 %v2710_v22 }
 0x12e   :  { %2269 = vmatpush3.bf16.msra.mxu0 %v2711_v23 }
 0x12f   :  { %2270 = vmatprep.subr.bf16.mxu0 %v2712_v24 }
 0x132   :  { %2271 = vmatpush3.bf16.msra.mxu0 %v2713_v25 }
 0x135   :  { %v2364_v29 = vpop.f32.mrb[16].mxu0 }
 0x136   :  { %v980_v30 = vadd.f32 %v2364_v29, %v931_v27  ;;  %v971_v31 = vpop.f32.mrb[17].mxu0  ;;  %v2714_v27 = vld [vmem:[%s3479_s8 + $0x60] sm:$0xff]   ;;  %v2716_v29 = vld [vmem:[%s3479_s8 + $0x68] sm:$0xff]  }
 0x137   :  { %v972_v33 = vadd.f32 %v971_v31, %v923_v10  ;;  %v2365_v34 = vpop.f32.mrb[18].mxu0  ;;  %v2696_v10 = vld [vmem:[%s3475_s6 + $0x14] ss:$24 sps:$4 sm:$0xff]   ;;  %2272 = vmatprep.subr.bf16.mxu0 %v2714_v27 }
 0x138   :  { %v988_v35 = vmax.f32 %v980_v30, 0.0  ;;  %v983_v36 = vadd.f32 %v2365_v34, %v934_v28  ;;  %v974_v37 = vpop.f32.mrb[19].mxu0  ;;  %v2715_v28 = vld [vmem:[%s3479_s8 + $0x20] sm:$0xff]   ;;  %v2717_v30 = vld [vmem:[%s3479_s8 + $0x28] sm:$0xff]   ;;  %v2718_v31 = vld [vmem:[%s3479_s8 + $0x70] sm:$0xff]  }
 0x139   :  { %v986_v38 = vmax.f32 %v972_v33, 0.0  ;;  %v975_v39 = vadd.f32 %v974_v37, %v926_v13  ;;  %v2697_v13 = vld [vmem:[%s3475_s6 + $0x40] ss:$24 sps:$4 sm:$0xff]   ;;  %2273 = vmatpush3.bf16.msra.mxu0 %v2715_v28  ;;  %v2724_v37 = vld [vmem:[%s3480_s10 + $0x10] sm:$0xff]  }
 0x13a   :  { %v997_v40 = vmul.f32 %v2079_v32, %v988_v35  ;;  %v989_v41 = vmax.f32 %v983_v36, 0.0  ;;  %2274 = vmatprep.subr.bf16.mxu0 %v2716_v29  ;;  %v2720_v33 = vld [vmem:[%s3479_s8 + $0x78] sm:$0xff]   ;;  %v2722_v35 = vld [vmem:[%s3480_s10] sm:$0xff]   ;;  %v2723_v36 = vld [vmem:[%s3480_s10 + $0x8] sm:$0xff]  }
 0x13b   :  { %v995_v43 = vmul.f32 %v2079_v32, %v986_v38  ;;  %v987_v44 = vmax.f32 %v975_v39, 0.0  ;;  %v2721_v34 = vld [vmem:[%s3479_s8 + $0x38] sm:$0xff]   ;;  %v2726_v39 = vld [vmem:[%s3480_s10 + $0x20] sm:$0xff]  }
 0x13c   :  { %v998_v45 = vmul.f32 %v2079_v32, %v989_v41  ;;  %v1006_v47 = vadd.f32 %v2080_v42, %v997_v40  ;;  %v2725_v38 = vld [vmem:[%s3480_s10 + $0x18] sm:$0xff]   ;;  %v2727_v40 = vld [vmem:[%s3480_s10 + $0x28] sm:$0xff]  }
 0x13d   :  { %v996_v46 = vmul.f32 %v2079_v32, %v987_v44  ;;  %v1004_v49 = vadd.f32 %v2080_v42, %v995_v43  ;;  %2275 = vmatpush3.bf16.msra.mxu0 %v2717_v30  ;;  %v2719_v32 = vld [vmem:[%s3479_s8 + $0x30] sm:$0xff]   ;;  %v1114_v43 = vlaneseq }
 0x13e   :  { %v1007_v48 = vadd.f32 %v2080_v42, %v998_v45  ;;  %2276 = vmatprep.subr.bf16.mxu0 %v2718_v31 }
 0x13f   :  { %v1005_v50 = vadd.f32 %v2080_v42, %v996_v46  ;;  %v1115_v44 = vshrl.u32 %v1114_v43, 7  ;;  %v1112_v46 = vld [vmem:[%s3481_s7] sm:$0x3f]  ;;  %v1732_v43 = vld [vmem:[%s3482_s12 + $0x88] sm:$0xff] }
 0x140   :  { %v1009_v51 = vmax.f32 %v1006_v47, %v1007_v48 }
 0x141   :  { %v1008_v52 = vmax.f32 %v1004_v49, %v1005_v50  ;;  %2277 = vmatpush3.bf16.msra.mxu0 %v2719_v32  ;;  %v1116_v45 = vsub.s32 0, %v1115_v44  ;;  %v1120_v47 = vsub.s32 1, %v1115_v44 }
 0x142   :  { %2278 = vmatprep.subr.bf16.mxu0 %v2720_v33 }
 0x143   :  { %v1010_v54 = vmax.f32 %v1008_v52, %v1009_v51  ;;  %v1117_v48 = vrot.slane %v1112_v46, %v1116_v45  ;;  %v1121_v49 = vrot.slane %v1112_v46, %v1120_v47  ;;  %v1734_v47 = vld [vmem:[%s3482_s12 + $0x98] sm:$0xff] }
 0x145   :  { %2367 = vmatpush3.msra.mxu1 %v1010_v54  ;;  %2279 = vmatpush3.bf16.msra.mxu0 %v2721_v34 }
 0x146   :  { %1268 = vmatprep.subr.bf16.mxu1 %v2672_v53  ;;  %2369 = vmatmul.mubr.msk.f32.vlgmr.msra.gmra.mrb[16].mxu1 %vm1012_vm1, %v1011_v56 }
 0x147   :  { %1269 = vmatpush1.bf16.msra.mxu1 %v2670_v55  ;;  %1300 = vmatprep.mubr.bf16.mxu1 %v2756_v59 }
 0x148   :  { %1270 = vmatprep.subr.bf16.mxu1 %v2675_v57 }
 0x14b   :  { %1271 = vmatpush1.bf16.msra.mxu1 %v2673_v58  ;;  %v1124_v58 = vsub.s32 2, %v1115_v44 }
 0x14c   :  { %1272 = vmatprep.subr.bf16.mxu1 %v2678_v60 }
 0x14d   :  { %v1125_v60 = vrot.slane %v1112_v46, %v1124_v58  ;;  %v1741_v58 = vld [vmem:[%s3482_s12 + $0xd0] sm:$0xff] }
 0x14f   :  { %1273 = vmatpush1.bf16.msra.mxu1 %v2676_v61 }
 0x150   :  { %1274 = vmatprep.subr.bf16.mxu1 %v2681_v62 }
 0x153   :  { %1275 = vmatpush1.bf16.msra.mxu1 %v2679_v63 }
 0x154   :  { %1309 = vmatprep.subr.bf16.mxu1 %v2684_v1 }
 0x156   :  { %2106 = vmatmul.mubr.msk.bf16.vlgmr.msra.gmra.mrb[20].mxu1 %vm1264_vm2, %v1087_v2 }
 0x157   :  { %1310 = vmatpush1.bf16.msra.mxu1 %v2682_v3  ;;  %1341 = vmatprep.mubr.bf16.mxu1 %v2756_v59 }
 0x158   :  { %1311 = vmatprep.subr.bf16.mxu1 %v2687_v4 }
 0x15b   :  { %1312 = vmatpush1.bf16.msra.mxu1 %v2685_v5 }
 0x15c   :  { %1313 = vmatprep.subr.bf16.mxu1 %v2690_v6 }
 0x15f   :  { %1314 = vmatpush1.bf16.msra.mxu1 %v2688_v7 }
 0x160   :  { %1315 = vmatprep.subr.bf16.mxu1 %v2693_v8  ;;  %v1132_v8 = vsub.s32 4, %v1115_v44 }
 0x163   :  { %1316 = vmatpush1.bf16.msra.mxu1 %v2691_v9  ;;  %v1136_v9 = vsub.s32 5, %v1115_v44 }
 0x164   :  { %1350 = vmatprep.subr.bf16.mxu1 %v2696_v10 }
 0x166   :  { %2107 = vmatmul.mubr.msk.bf16.vlgmr.msra.gmra.mrb[24].mxu1 %vm1264_vm2, %v1087_v2 }
 0x167   :  { %1351 = vmatpush1.bf16.msra.mxu1 %v2694_v11  ;;  %1382 = vmatprep.mubr.bf16.mxu1 %v2756_v59  ;;  %v1128_v59 = vsub.s32 3, %v1115_v44  ;;  %v2757_v44 = vmov 0.0|0.0  }
 0x168   :  { %1352 = vmatprep.subr.bf16.mxu1 %v2699_v12  ;;  %v1133_v12 = vrot.slane %v1112_v46, %v1132_v8  ;;  %2496 = vmatprep.subr.bf16.mxu0 %v2757_v44  ;;  %v1890_v8 = vld [vmem:[%s3482_s12 + $0x118] sm:$0xff] }
 0x169   :  { %v1129_v61 = vrot.slane %v1112_v46, %v1128_v59  ;;  %v1742_v59 = vld [vmem:[%s3482_s12 + $0xd8] sm:$0xff] }
 0x16b   :  { %1353 = vmatpush1.bf16.msra.mxu1 %v2697_v13 }
 0x16c   :  { %1354 = vmatprep.subr.bf16.mxu1 %v2702_v14  ;;  %v1137_v14 = vrot.slane %v1112_v46, %v1136_v9  ;;  %v1733_v46 = vld [vmem:[%s3482_s12 + $0x90] sm:$0xff] }
 0x16f   :  { %1355 = vmatpush1.bf16.msra.mxu1 %v2700_v15 }
 0x170   :  { %1356 = vmatprep.subr.bf16.mxu1 %v2705_v16 }
 0x173   :  { %1357 = vmatpush1.bf16.msra.mxu1 %v2703_v17 }
 0x174   :  { %2371 = vmatprep.subr.bf16.mxu1 %v2754_v26 }
 0x176   :  { %2108 = vmatmul.mubr.msk.bf16.vlgmr.msra.gmra.mrb[28].mxu1 %vm1264_vm2, %v1087_v2 }
 0x177   :  { %2387 = vmatprep.mubr.msk.bf16.mxu1 %vm2755_vm0, %v2754_v26  ;;  %2372 = vmatpush3.bf16.msra.mxu1 %v2722_v35 }
 0x178   :  { %2373 = vmatprep.subr.bf16.mxu1 %v2754_v26 }
 0x17b   :  { %2374 = vmatpush3.bf16.msra.mxu1 %v2723_v36 }
 0x17c   :  { %2375 = vmatprep.subr.bf16.mxu1 %v2754_v26 }
 0x17f   :  { %2376 = vmatpush3.bf16.msra.mxu1 %v2724_v37 }
 0x180   :  { %2377 = vmatprep.subr.bf16.mxu1 %v2754_v26 }
 0x183   :  { %2378 = vmatpush3.bf16.msra.mxu1 %v2725_v38 }
 0x184   :  { %2379 = vmatprep.subr.bf16.mxu1 %v2754_v26 }
 0x187   :  { %2380 = vmatpush3.bf16.msra.mxu1 %v2726_v39  ;;  %v2728_v39 = vld [vmem:[%s3480_s10 + $0x30] sm:$0xff]  }
 0x188   :  { %2381 = vmatprep.subr.bf16.mxu1 %v2754_v26 }
 0x18b   :  { %2382 = vmatpush3.bf16.msra.mxu1 %v2727_v40  ;;  %v2729_v40 = vld [vmem:[%s3480_s10 + $0x38] sm:$0xff]  }
 0x18c   :  { %2383 = vmatprep.subr.bf16.mxu1 %v2754_v26 }
 0x18f   :  { %2384 = vmatpush3.bf16.msra.mxu1 %v2728_v39  ;;  %v1717_v39 = vld [vmem:[%s3482_s12 + $0x18] sm:$0xff] }
 0x190   :  { %2385 = vmatprep.subr.bf16.mxu1 %v2754_v26 }
 0x193   :  { %2386 = vmatpush3.bf16.msra.mxu1 %v2729_v40 }
 0x194   :  { %2520 = vmatprep.subr.bf16.mxu1 %v2757_v44 }
 0x219   :  { %v3271_v41 = vpop.f32.mrb[16].mxu1 }
 0x21a   :  { %v2370_v42 = vpop.f32.mrb[17].mxu1 }
 0x21b   :  { %v1731_v42 = vld [vmem:[%s3482_s12 + $0x80] sm:$0xff] }
 0x21c   :  { %v2497_v45 = vpack.c.bf16 %v1732_v43, %v1731_v42  ;;  %v1718_v42 = vld [vmem:[%s3482_s12 + $0x20] sm:$0xff]  ;;  %v1719_v43 = vld [vmem:[%s3482_s12 + $0x28] sm:$0xff] }
 0x229   :  { %v1302_v50 = vpop.f32.mrb[20].mxu1 }
 0x22a   :  { %v1303_v51 = vadd.f32 %v1302_v50, %v1117_v48  ;;  %v1304_v52 = vpop.f32.mrb[21].mxu1  ;;  %v2500_v48 = vpack.c.bf16 %v1734_v47, %v1733_v46  ;;  %v1736_v50 = vld [vmem:[%s3482_s12 + $0xa8] sm:$0xff]  ;;  %v1720_v46 = vld [vmem:[%s3482_s12 + $0x30] sm:$0xff] }
 0x22b   :  { %v1305_v53 = vadd.f32 %v1304_v52, %v1121_v49  ;;  %v1306_v54 = vpop.f32.mrb[22].mxu1  ;;  %v1735_v49 = vld [vmem:[%s3482_s12 + $0xa0] sm:$0xff]  ;;  %v1737_v52 = vld [vmem:[%s3482_s12 + $0xb0] sm:$0xff] }
 0x22c   :  { %v2109_v55 = vmul.f32 -1.442695, %v1303_v51  ;;  %v1307_v56 = vpop.f32.mrb[23].mxu1  ;;  %v2503_v51 = vpack.c.bf16 %v1736_v50, %v1735_v49  ;;  %v1723_v49 = vld [vmem:[%s3482_s12 + $0x48] sm:$0xff] }
 0x22d   :  { %v2110_v57 = vmul.f32 -1.442695, %v1305_v53  ;;  %v1738_v53 = vld [vmem:[%s3482_s12 + $0xb8] sm:$0xff]  ;;  %v1740_v56 = vld [vmem:[%s3482_s12 + $0xc8] sm:$0xff] }
 0x22e   :  { %2730 = vpow2.f32 %v2109_v55  ;;  %v2506_v54 = vpack.c.bf16 %v1738_v53, %v1737_v52  ;;  %v1739_v55 = vld [vmem:[%s3482_s12 + $0xc0] sm:$0xff]  ;;  %v1725_v52 = vld [vmem:[%s3482_s12 + $0x58] sm:$0xff] }
 0x22f   :  { %2732 = vpow2.f32 %v2110_v57  ;;  %v2509_v57 = vpack.c.bf16 %v1740_v56, %v1739_v55  ;;  %v1727_v55 = vld [vmem:[%s3482_s12 + $0x68] sm:$0xff] }
 0x238   :  { %v2731_v62 = vpop.eup %2730 }
 0x239   :  { %v2733_v63 = vpop.eup %2732  ;;  %v1397_v0 = vadd.f32 1.0, %v2731_v62  ;;  %v1343_v1 = vpop.f32.mrb[24].mxu1  ;;  %v1744_v62 = vld [vmem:[%s3482_s12 + $0xe8] sm:$0xff] }
 0x23a   :  { %v1398_v2 = vadd.f32 1.0, %v2733_v63  ;;  %v1344_v3 = vadd.f32 %v1343_v1, %v1125_v60  ;;  %v1345_v4 = vpop.f32.mrb[25].mxu1  ;;  %v2512_v60 = vpack.c.bf16 %v1742_v59, %v1741_v58  ;;  %v1746_v1 = vld [vmem:[%s3482_s12 + $0xf8] sm:$0xff] }
 0x23b   :  { %2734 = vrcp.f32 %v1397_v0  ;;  %v1346_v5 = vadd.f32 %v1345_v4, %v1129_v61  ;;  %v1347_v6 = vpop.f32.mrb[26].mxu1  ;;  %v1743_v61 = vld [vmem:[%s3482_s12 + $0xe0] sm:$0xff]  ;;  %v1745_v0 = vld [vmem:[%s3482_s12 + $0xf0] sm:$0xff]  ;;  %v1729_v58 = vld [vmem:[%s3482_s12 + $0x78] sm:$0xff] }
 0x23c   :  { %2736 = vrcp.f32 %v1398_v2  ;;  %v1348_v7 = vpop.f32.mrb[27].mxu1  ;;  %v2515_v63 = vpack.c.bf16 %v1744_v62, %v1743_v61  ;;  %v2518_v2 = vpack.c.bf16 %v1746_v1, %v1745_v0  ;;  %v1887_v4 = vld [vmem:[%s3482_s12 + $0x100] sm:$0xff]  ;;  %v1889_v6 = vld [vmem:[%s3482_s12 + $0x110] sm:$0xff]  ;;  %v1902_v61 = vld [vmem:[%s3482_s12 + $0x178] sm:$0xff] }
 0x23d   :  { %2738 = vtanh.f32 %v1344_v3  ;;  %v1730_v3 = vld [vmem:[%s3483_s4] sm:$0x3]  ;;  %v2548_v9 = vpack.c.bf16 %v1890_v8, %v1889_v6 }
 0x23e   :  { %2740 = vtanh.f32 %v1346_v5  ;;  %v1888_v5 = vld [vmem:[%s3482_s12 + $0x108] sm:$0xff]  ;;  %v2130_v1 = vld [vmem:[%s3485_s11] ss:$0 sm:$0xff] }
 0x23f   :  { %v2545_v7 = vpack.c.bf16 %v1888_v5, %v1887_v4 }
 0x245   :  { %v2735_v10 = vpop.eup %2734 }
 0x246   :  { %v2737_v11 = vpop.eup %2736 }
 0x247   :  { %v2739_v13 = vpop.eup %2738 }
 0x248   :  { %v2741_v15 = vpop.eup %2740  ;;  %v1405_v16 = vmul.f32 %v2739_v13, %v2735_v10  ;;  %v1891_v10 = vld [vmem:[%s3482_s12 + $0x120] sm:$0xff]  ;;  %v1893_v13 = vld [vmem:[%s3482_s12 + $0x130] sm:$0xff] }
 0x249   :  { %v1406_v17 = vmul.f32 %v2741_v15, %v2737_v11  ;;  %v1384_v18 = vpop.f32.mrb[28].mxu1  ;;  %v1892_v11 = vld [vmem:[%s3482_s12 + $0x128] sm:$0xff] }
 0x24a   :  { %v1385_v19 = vadd.f32 %v1384_v18, %v1133_v12  ;;  %v1386_v20 = vpop.f32.mrb[29].mxu1  ;;  %v2551_v12 = vpack.c.bf16 %v1892_v11, %v1891_v10  ;;  %v2139_v10 = vld [vmem:[%s3486_s13] ss:$0 sm:$0xff] }
 0x24b   :  { %v1387_v21 = vadd.f32 %v1386_v20, %v1137_v14  ;;  %v1388_v22 = vpop.f32.mrb[30].mxu1  ;;  %v1894_v14 = vld [vmem:[%s3482_s12 + $0x138] sm:$0xff] }
 0x24c   :  { %v2111_v23 = vmul.f32 -1.442695, %v1385_v19  ;;  %v1389_v24 = vpop.f32.mrb[31].mxu1  ;;  %v2554_v15 = vpack.c.bf16 %v1894_v14, %v1893_v13  ;;  %v1897_v19 = vld [vmem:[%s3482_s12 + $0x150] sm:$0xff]  ;;  %v1898_v20 = vld [vmem:[%s3482_s12 + $0x158] sm:$0xff]  ;;  %v1899_v22 = vld [vmem:[%s3482_s12 + $0x160] sm:$0xff] }
 0x24d   :  { %v2112_v25 = vmul.f32 -1.442695, %v1387_v21  ;;  %v2560_v21 = vpack.c.bf16 %v1898_v20, %v1897_v19 }
 0x24e   :  { %2742 = vpow2.f32 %v2111_v23  ;;  %v1900_v23 = vld [vmem:[%s3482_s12 + $0x168] sm:$0xff] }
 0x24f   :  { %2744 = vpow2.f32 %v2112_v25  ;;  %v2563_v24 = vpack.c.bf16 %v1900_v23, %v1899_v22 }
 0x250   :  { %2746 = vtanh.f32 %v1405_v16  ;;  %v1895_v16 = vld [vmem:[%s3482_s12 + $0x140] sm:$0xff] }
 0x251   :  { %2748 = vtanh.f32 %v1406_v17  ;;  %v1896_v17 = vld [vmem:[%s3482_s12 + $0x148] sm:$0xff] }
 0x252   :  { %v2557_v18 = vpack.c.bf16 %v1896_v17, %v1895_v16 }
 0x258   :  { %v2743_v27 = vpop.eup %2742 }
 0x259   :  { %v2745_v28 = vpop.eup %2744  ;;  %v1413_v29 = vadd.f32 1.0, %v2743_v27  ;;  %v2113_v27 = vld [vmem:[%s3484_s9] ss:$0 sm:$0xff] }
 0x25a   :  { %v1414_v30 = vadd.f32 1.0, %v2745_v28  ;;  %v2747_v31 = vpop.eup %2746 }
 0x25b   :  { %2750 = vrcp.f32 %v1413_v29  ;;  %v2749_v32 = vpop.eup %2748 }
 0x25c   :  { %2752 = vrcp.f32 %v1414_v30 }
 0x265   :  { %v2751_v33 = vpop.eup %2750 }
 0x266   :  { %v2753_v34 = vpop.eup %2752  ;;  %v1421_v35 = vmul.f32 %v2751_v33, %v2747_v31  ;;  %v1714_v33 = vld [vmem:[%s3482_s12] sm:$0xff] }
 0x267   :  { %v1422_v36 = vmul.f32 %v2753_v34, %v2749_v32  ;;  %v1715_v34 = vld [vmem:[%s3482_s12 + $0x8] sm:$0xff] }
 0x268   :  { %v1423_v38 = vpack.c.bf16 %v1421_v35, %v1421_v35 }
 0x269   :  { %v1424_v37 = vpack.c.bf16 %v1422_v36, %v1422_v36  ;;  %v2521_v36 = vpack.c.bf16 %v1715_v34, %v1714_v33 }
 0x26b   :  { %1592 = vmatprep.mubr.bf16.mxu0 %v1424_v37 }
 0x26c   :  { %1593 = vmatmul.mubr.bf16.vlgmr.msra.gmra.mrb[20].mxu0 %v1423_v38  ;;  %v1716_v38 = vld [vmem:[%s3482_s12 + $0x10] sm:$0xff] }
 0x26d   :  { %2423 = vmatprep.mubr.msk.f32.mxu0 %vm2755_vm0, %v2754_v26  ;;  %2498 = vmatpush3.bf16.msra.mxu0 %v2497_v45  ;;  %v2524_v40 = vpack.c.bf16 %v1717_v39, %v1716_v38  ;;  %v2527_v45 = vpack.c.bf16 %v1719_v43, %v1718_v42 }
 0x26e   :  { %2499 = vmatprep.subr.bf16.mxu0 %v2757_v44 }
 0x271   :  { %2501 = vmatpush3.bf16.msra.mxu0 %v2500_v48  ;;  %v1722_v48 = vld [vmem:[%s3482_s12 + $0x40] sm:$0xff] }
 0x272   :  { %2502 = vmatprep.subr.bf16.mxu0 %v2757_v44  ;;  %v2533_v50 = vpack.c.bf16 %v1723_v49, %v1722_v48 }
 0x275   :  { %2504 = vmatpush3.bf16.msra.mxu0 %v2503_v51  ;;  %v1724_v51 = vld [vmem:[%s3482_s12 + $0x50] sm:$0xff] }
 0x276   :  { %2505 = vmatprep.subr.bf16.mxu0 %v2757_v44  ;;  %v2536_v53 = vpack.c.bf16 %v1725_v52, %v1724_v51 }
 0x279   :  { %2507 = vmatpush3.bf16.msra.mxu0 %v2506_v54  ;;  %v1726_v54 = vld [vmem:[%s3482_s12 + $0x60] sm:$0xff] }
 0x27a   :  { %2508 = vmatprep.subr.bf16.mxu0 %v2757_v44  ;;  %v2539_v56 = vpack.c.bf16 %v1727_v55, %v1726_v54 }
 0x27d   :  { %2510 = vmatpush3.bf16.msra.mxu0 %v2509_v57  ;;  %v1728_v57 = vld [vmem:[%s3482_s12 + $0x70] sm:$0xff] }
 0x27e   :  { %2511 = vmatprep.subr.bf16.mxu0 %v2757_v44  ;;  %v2542_v59 = vpack.c.bf16 %v1729_v58, %v1728_v57 }
 0x281   :  { %2513 = vmatpush3.bf16.msra.mxu0 %v2512_v60  ;;  %v1901_v60 = vld [vmem:[%s3482_s12 + $0x170] sm:$0xff] }
 0x282   :  { %2514 = vmatprep.subr.bf16.mxu0 %v2757_v44  ;;  %v2566_v62 = vpack.c.bf16 %v1902_v61, %v1901_v60 }
 0x285   :  { %2516 = vmatpush3.bf16.msra.mxu0 %v2515_v63 }
 0x286   :  { %2517 = vmatprep.subr.bf16.mxu0 %v2757_v44 }
 0x289   :  { %2519 = vmatpush3.bf16.msra.mxu0 %v2518_v2 }
 0x28a   :  { %2544 = vmatprep.subr.bf16.mxu0 %v2757_v44 }
 0x28c   :  { %2424 = vmatmul.mubr.f32.vlgmr.msra.gmra.mrb[24].mxu0 %v1730_v3 }
 0x28d   :  { %2493 = vmatprep.mubr.msk.f32.mxu0 %vm2755_vm0, %v2754_v26  ;;  %2546 = vmatpush3.bf16.msra.mxu0 %v2545_v7 }
 0x28e   :  { %2547 = vmatprep.subr.bf16.mxu0 %v2757_v44 }
 0x291   :  { %2549 = vmatpush3.bf16.msra.mxu0 %v2548_v9 }
 0x292   :  { %2550 = vmatprep.subr.bf16.mxu0 %v2757_v44 }
 0x295   :  { %2552 = vmatpush3.bf16.msra.mxu0 %v2551_v12 }
 0x296   :  { %2553 = vmatprep.subr.bf16.mxu0 %v2757_v44 }
 0x299   :  { %2555 = vmatpush3.bf16.msra.mxu0 %v2554_v15 }
 0x29a   :  { %2556 = vmatprep.subr.bf16.mxu0 %v2757_v44 }
 0x29d   :  { %2558 = vmatpush3.bf16.msra.mxu0 %v2557_v18 }
 0x29e   :  { %2559 = vmatprep.subr.bf16.mxu0 %v2757_v44 }
 0x2a1   :  { %2561 = vmatpush3.bf16.msra.mxu0 %v2560_v21 }
 0x2a2   :  { %2562 = vmatprep.subr.bf16.mxu0 %v2757_v44 }
 0x2a5   :  { %2564 = vmatpush3.bf16.msra.mxu0 %v2563_v24 }
 0x2a6   :  { %2565 = vmatprep.subr.bf16.mxu0 %v2757_v44 }
 0x2a9   :  { %2567 = vmatpush3.bf16.msra.mxu0 %v2566_v62 }
 0x33f   :  { %v2280_v25 = vpop.f32.mrb[20].mxu0 }
 0x340   :  { %v2281_v28 = vpop.f32.mrb[21].mxu0 }
 0x341   :  { %v2282_v29 = vadd.f32 %v2281_v28, %v2280_v25  ;;  %v2283_v30 = vpop.f32.mrb[22].mxu0 }
 0x342   :  { %v2284_v31 = vpop.f32.mrb[23].mxu0 }
 0x343   :  { %v1595_v32 = vadd.f32 %v2282_v29, %v2113_v27 }
 0x345   :  { %v1600_v35 = vmax.f32 %v1595_v32, 0.0 }
 0x347   :  { %v1601_v37 = vpack.c.bf16 %v1600_v35, %v1600_v35 }
 0x349   :  { %2388 = vmatmul.mubr.bf16.vlgmr.msra.gmra.mrb[32].mxu1 %v1601_v37 }
 0x34a   :  { %2522 = vmatpush3.bf16.msra.mxu1 %v2521_v36  ;;  %2458 = vmatprep.mubr.msk.f32.mxu1 %vm2755_vm0, %v2754_v26  ;;  %v1721_v26 = vld [vmem:[%s3482_s12 + $0x38] sm:$0xff] }
 0x34b   :  { %2523 = vmatprep.subr.bf16.mxu1 %v2757_v44  ;;  %v2530_v47 = vpack.c.bf16 %v1721_v26, %v1720_v46 }
 0x34e   :  { %2525 = vmatpush3.bf16.msra.mxu1 %v2524_v40 }
 0x34f   :  { %2526 = vmatprep.subr.bf16.mxu1 %v2757_v44 }
 0x352   :  { %2528 = vmatpush3.bf16.msra.mxu1 %v2527_v45 }
 0x353   :  { %2529 = vmatprep.subr.bf16.mxu1 %v2757_v44 }
 0x356   :  { %2531 = vmatpush3.bf16.msra.mxu1 %v2530_v47 }
 0x357   :  { %2532 = vmatprep.subr.bf16.mxu1 %v2757_v44 }
 0x35a   :  { %2534 = vmatpush3.bf16.msra.mxu1 %v2533_v50 }
 0x35b   :  { %2535 = vmatprep.subr.bf16.mxu1 %v2757_v44 }
 0x35e   :  { %2537 = vmatpush3.bf16.msra.mxu1 %v2536_v53 }
 0x35f   :  { %2538 = vmatprep.subr.bf16.mxu1 %v2757_v44  ;;  %v1813_v63 = vpop.f32.mrb[24].mxu0 }
 0x360   :  { %v2425_v0 = vpop.f32.mrb[25].mxu0 }
 0x362   :  { %2540 = vmatpush3.bf16.msra.mxu1 %v2539_v56 }
 0x363   :  { %2541 = vmatprep.subr.bf16.mxu1 %v2757_v44 }
 0x366   :  { %2543 = vmatpush3.bf16.msra.mxu1 %v2542_v59 }
 0x369   :  { %2459 = vmatmul.mubr.f32.vlgmr.msra.gmra.mrb[18].mxu1 %v3271_v41 }
 0x41c   :  { %v1707_v44 = vpop.f32.mrb[32].mxu1 }
 0x41d   :  { %v1708_v2 = vadd.f32 %v2130_v1, %v1707_v44  ;;  %v2389_v3 = vpop.f32.mrb[33].mxu1 }
 0x41e   :  { %v1710_v41 = vpop.f32.mrb[34].mxu1 }
 0x41f   :  { %v1713_v4 = vmax.f32 %v1708_v2, 0.0  ;;  %v2390_v5 = vpop.f32.mrb[35].mxu1 }
 0x421   :  { %2494 = vmatmul.mubr.f32.vlgmr.msra.gmra.mrb[26].mxu0 %v1713_v4 }
 0x43c   :  { %v1883_v6 = vpop.f32.mrb[18].mxu1 }
 0x43d   :  { %v1884_v7 = vadd.f32 %v1883_v6, %v1813_v63  ;;  %v2460_v8 = vpop.f32.mrb[19].mxu1 }
 0x4f4   :  { %v1969_v9 = vpop.f32.mrb[26].mxu0 }
 0x4f5   :  { %v1973_v11 = vadd.f32 %v1969_v9, %v1884_v7  ;;  %v2495_v12 = vpop.f32.mrb[27].mxu0 }
 0x4f7   :  { %v1981_v13 = vadd.f32 %v2139_v10, %v1973_v11 }
 0x4f9   :  { %1983 = vst.msk [vmem:[%s3487_s14] sm:$0x3] %vm1982_vm3, %v1981_v13 }

</bundles_post_ra>
